<compile_context>
chip_gen: v5e
topology: v5e:2x2
jax: 0.10.0
libtpu: 0.0.40
codegen_flags: <defaults>
</compile_context>

<pallas_src>
import jax
import jax.numpy as jnp
from jax.experimental import pallas as pl
from jax.experimental.pallas import tpu as pltpu


def _round_up(x, m):
    return ((x + m - 1) // m) * m


def conv3d_bn(x_ncdhw, weight_oidhw, gamma, beta, running_mean, running_var,
              eps=1e-5, tile_lanes=512):
    """Conv3d(padding='same', stride=1, bias=False) + BatchNorm3d + ReLU.

    x_ncdhw:      (N, Cin, D, H, W)
    weight_oidhw: (Cout, Cin, KD, KH, KW)
    returns:      (N, Cout, D, H, W)
    """
    N, Cin, D, H, W = x_ncdhw.shape
    Cout, _, KD, KH, KW = weight_oidhw.shape
    pd, ph, pw = KD // 2, KH // 2, KW // 2
    Dp, Hp, Wp = D + 2 * pd, H + 2 * ph, W + 2 * pw

    Lp = Dp * Hp * Wp                        # flattened *padded* output grid
    margin = pd * Hp * Wp + ph * Wp + pw     # max flat shift of any tap
    KC = KD * KH * KW * Cin                  # contraction size (e.g. 108)
    KPAD = _round_up(KC, 128)                # pad K to the MXU depth

    TL = min(_round_up(Lp, 128), _round_up(max(tile_lanes, 128), 128))
    NJ = -(-Lp // TL)                        # number of lane chunks
    Lopad = NJ * TL
    WIN = TL + _round_up(2 * margin, 128)    # chunk + static halo
    Ltot = Lopad + (WIN - TL)                # margin-padded flat input length

    out_dtype = x_ncdhw.dtype

    # ---------------- wrapper-side layout plumbing (plain JAX) ----------------
    xb = x_ncdhw.astype(jnp.bfloat16)
    x_pad = jnp.pad(xb, ((0, 0), (0, 0), (pd, pd), (ph, ph), (pw, pw)))
    x_flat = jnp.pad(x_pad.reshape(N, Cin, Lp),
                     ((0, 0), (0, 0), (margin, Ltot - Lp - margin)))
    # Overlapping (halo'd) windows so every in-kernel slice has a static start.
    x_win = jnp.stack(
        [jax.lax.slice_in_dim(x_flat, j * TL, j * TL + WIN, axis=2)
         for j in range(NJ)],
        axis=1)                                              # (N, NJ, Cin, WIN)

    # Fold BN (inference, running stats) scale into the conv weights.
    scale = (gamma / jnp.sqrt(running_var + eps)).astype(jnp.float32)   # (Cout,)
    bias = (beta - running_mean * scale).astype(jnp.float32)            # (Cout,)
    w_scaled = weight_oidhw.astype(jnp.float32) * scale[:, None, None, None, None]
    # (Cout, KD, KH, KW, Cin) -> (Cout, KC); column order = tap-major, Cin-minor.
    w_mat = jnp.transpose(w_scaled, (0, 2, 3, 4, 1)).reshape(Cout, KC)
    w_mat = jnp.pad(w_mat, ((0, 0), (0, KPAD - KC))).astype(jnp.bfloat16)
    bias2d = bias.reshape(Cout, 1)

    taps = [(kd, kh, kw) for kd in range(KD) for kh in range(KH) for kw in range(KW)]

    def kernel(x_ref, w_ref, b_ref, o_ref, col_ref):
        # x_ref:   (1, 1, Cin, WIN)  bf16  halo'd input window for this chunk
        # w_ref:   (Cout, KPAD)      bf16  BN-folded weights, K padded to 128
        # b_ref:   (Cout, 1)         f32   BN bias
        # o_ref:   (1, Cout, TL)           lane-dense output block
        # col_ref: (KPAD, TL)        bf16  VMEM im2col scratch
        window = x_ref[0, 0]                                 # (Cin, WIN)
        # Build the im2col slab: each tap is a static lane shift of the window.
        for t, (kd, kh, kw) in enumerate(taps):
            off = kd * Hp * Wp + kh * Wp + kw                # static offset
            col_ref[t * Cin:(t + 1) * Cin, :] = window[:, off:off + TL]
        if KPAD > KC:                                        # zero the K padding
            col_ref[KC:KPAD, :] = jnp.zeros((KPAD - KC, TL), col_ref.dtype)
        # Single big-K bf16 MXU matmul with f32 accumulation.
        acc = jnp.dot(w_ref[...], col_ref[...],
                      preferred_element_type=jnp.float32)    # (Cout, TL)
        y = jnp.maximum(acc + b_ref[...], 0.0)               # bias + ReLU
        o_ref[...] = y.reshape(1, Cout, TL).astype(o_ref.dtype)

    out_flat = pl.pallas_call(
        kernel,
        out_shape=jax.ShapeDtypeStruct((N, Cout, Lopad), out_dtype),
        grid_spec=pltpu.PrefetchScalarGridSpec(
            num_scalar_prefetch=0,
            grid=(N, NJ),
            in_specs=[
                pl.BlockSpec((1, 1, Cin, WIN), lambda n, j: (n, j, 0, 0)),
                pl.BlockSpec((Cout, KPAD), lambda n, j: (0, 0)),
                pl.BlockSpec((Cout, 1), lambda n, j: (0, 0)),
            ],
            out_specs=pl.BlockSpec((1, Cout, TL), lambda n, j: (n, 0, j)),
            scratch_shapes=[pltpu.VMEM((KPAD, TL), jnp.bfloat16)],
        ),
        compiler_params=pltpu.CompilerParams(
            dimension_semantics=("parallel", "parallel"),
            vmem_limit_bytes=64 << 20),
    )(x_win, w_mat, bias2d)

    # Drop lane padding, un-flatten onto the padded grid, keep the valid interior.
    out = out_flat[:, :, :Lp].reshape(N, Cout, Dp, Hp, Wp)
    out = out[:, :, pd:pd + D, ph:ph + H, pw:pw + W]         # (N, Cout, D, H, W)
    return out


def reference(x_ncdhw, weight_oidhw, gamma, beta, running_mean, running_var,
              eps=1e-5):
    y = jax.lax.conv_general_dilated(
        x_ncdhw, weight_oidhw,
        window_strides=(1, 1, 1),
        padding="SAME",
        dimension_numbers=("NCDHW", "OIDHW", "NCDHW"),
    )
    scale = gamma / jnp.sqrt(running_var + eps)
    bias = beta - running_mean * scale
    y = y * scale[None, :, None, None, None] + bias[None, :, None, None, None]
    return jnp.maximum(y, 0.0)


if __name__ == "__main__":
    # Shapes consistent with Conv3dBn(in_channels=4, out_channels=8,
    # kernel_size=(3,3,3), padding='same', strides=(1,1,1), use_bias=False).
    N, Cin, Cout = 2, 4, 8
    D = H = W = 8
    KD = KH = KW = 3

    key = jax.random.PRNGKey(0)
    kx, kw, kg, kb, km, kv = jax.random.split(key, 6)

    x = jax.random.normal(kx, (N, Cin, D, H, W), dtype=jnp.float32)
    weight = jax.random.normal(kw, (Cout, Cin, KD, KH, KW),
                               dtype=jnp.float32) * 0.1
    gamma = jax.random.uniform(kg, (Cout,), minval=0.5, maxval=1.5,
                               dtype=jnp.float32)
    beta = jax.random.normal(kb, (Cout,), dtype=jnp.float32) * 0.1
    running_mean = jax.random.normal(km, (Cout,), dtype=jnp.float32) * 0.1
    running_var = jax.random.uniform(kv, (Cout,), minval=0.5, maxval=1.5,
                                     dtype=jnp.float32)

    out = conv3d_bn(x, weight, gamma, beta, running_mean, running_var)
    out = jax.block_until_ready(out)

    ref = reference(x, weight, gamma, beta, running_mean, running_var)
    assert out.shape == (N, Cout, D, H, W)
    # bf16 MXU operands with f32 accumulation -> tolerance loosened vs pure f32.
    assert jnp.allclose(out, ref, atol=7e-2, rtol=7e-2), (
        float(jnp.max(jnp.abs(out - ref))))

    print("KERNEL_OK")
</pallas_src>

<mosaic_0001>
module attributes {stable_mosaic.version = 11 : i64} {
  func.func @kernel(%arg0: i32, %arg1: i32, %arg2: memref<1x1x4x768xbf16, #tpu.memory_space<vmem>>, %arg3: memref<8x128xbf16, #tpu.memory_space<vmem>>, %arg4: memref<8x1xf32, #tpu.memory_space<vmem>>, %arg5: memref<1x8x512xf32, #tpu.memory_space<vmem>>, %arg6: memref<128x512xbf16, #tpu.memory_space<vmem>>) attributes {dimension_semantics = [#tpu.dimension_semantics<parallel>, #tpu.dimension_semantics<parallel>], iteration_bounds = array<i64: 2, 2>, scalar_prefetch = 0 : i64, scratch_operands = 1 : i64, tpu.core_type = #tpu.core_type<tc>, window_params = [{transform_indices = @transform_0, window_bounds = array<i64: 1, 1, 4, 768>}, {pipeline_mode = #tpu.pipeline_mode<synchronous>, transform_indices = @transform_1, window_bounds = array<i64: 8, 128>}, {pipeline_mode = #tpu.pipeline_mode<synchronous>, transform_indices = @transform_2, window_bounds = array<i64: 8, 1>}, {transform_indices = @transform_3, window_bounds = array<i64: 1, 8, 512>}]} {
    %c0 = arith.constant 0 : index
    %c0_0 = arith.constant 0 : index
    %c0_1 = arith.constant 0 : index
    %c0_2 = arith.constant 0 : index
    %0 = vector.load %arg2[%c0, %c0_0, %c0_1, %c0_2] : memref<1x1x4x768xbf16, #tpu.memory_space<vmem>>, vector<1x1x4x768xbf16>
    %1 = vector.shape_cast %0 : vector<1x1x4x768xbf16> to vector<4x768xbf16>
    %2 = vector.extract_strided_slice %1 {offsets = [0, 0], sizes = [4, 512], strides = [1, 1]} : vector<4x768xbf16> to vector<4x512xbf16>
    %c0_3 = arith.constant 0 : index
    %c0_4 = arith.constant 0 : index
    %3 = vector.load %arg6[%c0_3, %c0_4] : memref<128x512xbf16, #tpu.memory_space<vmem>>, vector<4x512xbf16>
    tpu.vector_store %arg6[%c0_3, %c0_4], %2 {strides = array<i32>} : memref<128x512xbf16, #tpu.memory_space<vmem>>, vector<4x512xbf16>,
    %4 = vector.extract_strided_slice %1 {offsets = [0, 1], sizes = [4, 512], strides = [1, 1]} : vector<4x768xbf16> to vector<4x512xbf16>
    %c4 = arith.constant 4 : index
    %c0_5 = arith.constant 0 : index
    %5 = vector.load %arg6[%c4, %c0_5] : memref<128x512xbf16, #tpu.memory_space<vmem>>, vector<4x512xbf16>
    tpu.vector_store %arg6[%c4, %c0_5], %4 {strides = array<i32>} : memref<128x512xbf16, #tpu.memory_space<vmem>>, vector<4x512xbf16>,
    %6 = vector.extract_strided_slice %1 {offsets = [0, 2], sizes = [4, 512], strides = [1, 1]} : vector<4x768xbf16> to vector<4x512xbf16>
    %c8 = arith.constant 8 : index
    %c0_6 = arith.constant 0 : index
    %7 = vector.load %arg6[%c8, %c0_6] : memref<128x512xbf16, #tpu.memory_space<vmem>>, vector<4x512xbf16>
    tpu.vector_store %arg6[%c8, %c0_6], %6 {strides = array<i32>} : memref<128x512xbf16, #tpu.memory_space<vmem>>, vector<4x512xbf16>,
    %8 = vector.extract_strided_slice %1 {offsets = [0, 10], sizes = [4, 512], strides = [1, 1]} : vector<4x768xbf16> to vector<4x512xbf16>
    %c12 = arith.constant 12 : index
    %c0_7 = arith.constant 0 : index
    %9 = vector.load %arg6[%c12, %c0_7] : memref<128x512xbf16, #tpu.memory_space<vmem>>, vector<4x512xbf16>
    tpu.vector_store %arg6[%c12, %c0_7], %8 {strides = array<i32>} : memref<128x512xbf16, #tpu.memory_space<vmem>>, vector<4x512xbf16>,
    %10 = vector.extract_strided_slice %1 {offsets = [0, 11], sizes = [4, 512], strides = [1, 1]} : vector<4x768xbf16> to vector<4x512xbf16>
    %c16 = arith.constant 16 : index
    %c0_8 = arith.constant 0 : index
    %11 = vector.load %arg6[%c16, %c0_8] : memref<128x512xbf16, #tpu.memory_space<vmem>>, vector<4x512xbf16>
    tpu.vector_store %arg6[%c16, %c0_8], %10 {strides = array<i32>} : memref<128x512xbf16, #tpu.memory_space<vmem>>, vector<4x512xbf16>,
    %12 = vector.extract_strided_slice %1 {offsets = [0, 12], sizes = [4, 512], strides = [1, 1]} : vector<4x768xbf16> to vector<4x512xbf16>
    %c20 = arith.constant 20 : index
    %c0_9 = arith.constant 0 : index
    %13 = vector.load %arg6[%c20, %c0_9] : memref<128x512xbf16, #tpu.memory_space<vmem>>, vector<4x512xbf16>
    tpu.vector_store %arg6[%c20, %c0_9], %12 {strides = array<i32>} : memref<128x512xbf16, #tpu.memory_space<vmem>>, vector<4x512xbf16>,
    %14 = vector.extract_strided_slice %1 {offsets = [0, 20], sizes = [4, 512], strides = [1, 1]} : vector<4x768xbf16> to vector<4x512xbf16>
    %c24 = arith.constant 24 : index
    %c0_10 = arith.constant 0 : index
    %15 = vector.load %arg6[%c24, %c0_10] : memref<128x512xbf16, #tpu.memory_space<vmem>>, vector<4x512xbf16>
    tpu.vector_store %arg6[%c24, %c0_10], %14 {strides = array<i32>} : memref<128x512xbf16, #tpu.memory_space<vmem>>, vector<4x512xbf16>,
    %16 = vector.extract_strided_slice %1 {offsets = [0, 21], sizes = [4, 512], strides = [1, 1]} : vector<4x768xbf16> to vector<4x512xbf16>
    %c28 = arith.constant 28 : index
    %c0_11 = arith.constant 0 : index
    %17 = vector.load %arg6[%c28, %c0_11] : memref<128x512xbf16, #tpu.memory_space<vmem>>, vector<4x512xbf16>
    tpu.vector_store %arg6[%c28, %c0_11], %16 {strides = array<i32>} : memref<128x512xbf16, #tpu.memory_space<vmem>>, vector<4x512xbf16>,
    %18 = vector.extract_strided_slice %1 {offsets = [0, 22], sizes = [4, 512], strides = [1, 1]} : vector<4x768xbf16> to vector<4x512xbf16>
    %c32 = arith.constant 32 : index
    %c0_12 = arith.constant 0 : index
    %19 = vector.load %arg6[%c32, %c0_12] : memref<128x512xbf16, #tpu.memory_space<vmem>>, vector<4x512xbf16>
    tpu.vector_store %arg6[%c32, %c0_12], %18 {strides = array<i32>} : memref<128x512xbf16, #tpu.memory_space<vmem>>, vector<4x512xbf16>,
    %20 = vector.extract_strided_slice %1 {offsets = [0, 100], sizes = [4, 512], strides = [1, 1]} : vector<4x768xbf16> to vector<4x512xbf16>
    %c36 = arith.constant 36 : index
    %c0_13 = arith.constant 0 : index
    %21 = vector.load %arg6[%c36, %c0_13] : memref<128x512xbf16, #tpu.memory_space<vmem>>, vector<4x512xbf16>
    tpu.vector_store %arg6[%c36, %c0_13], %20 {strides = array<i32>} : memref<128x512xbf16, #tpu.memory_space<vmem>>, vector<4x512xbf16>,
    %22 = vector.extract_strided_slice %1 {offsets = [0, 101], sizes = [4, 512], strides = [1, 1]} : vector<4x768xbf16> to vector<4x512xbf16>
    %c40 = arith.constant 40 : index
    %c0_14 = arith.constant 0 : index
    %23 = vector.load %arg6[%c40, %c0_14] : memref<128x512xbf16, #tpu.memory_space<vmem>>, vector<4x512xbf16>
    tpu.vector_store %arg6[%c40, %c0_14], %22 {strides = array<i32>} : memref<128x512xbf16, #tpu.memory_space<vmem>>, vector<4x512xbf16>,
    %24 = vector.extract_strided_slice %1 {offsets = [0, 102], sizes = [4, 512], strides = [1, 1]} : vector<4x768xbf16> to vector<4x512xbf16>
    %c44 = arith.constant 44 : index
    %c0_15 = arith.constant 0 : index
    %25 = vector.load %arg6[%c44, %c0_15] : memref<128x512xbf16, #tpu.memory_space<vmem>>, vector<4x512xbf16>
    tpu.vector_store %arg6[%c44, %c0_15], %24 {strides = array<i32>} : memref<128x512xbf16, #tpu.memory_space<vmem>>, vector<4x512xbf16>,
    %26 = vector.extract_strided_slice %1 {offsets = [0, 110], sizes = [4, 512], strides = [1, 1]} : vector<4x768xbf16> to vector<4x512xbf16>
    %c48 = arith.constant 48 : index
    %c0_16 = arith.constant 0 : index
    %27 = vector.load %arg6[%c48, %c0_16] : memref<128x512xbf16, #tpu.memory_space<vmem>>, vector<4x512xbf16>
    tpu.vector_store %arg6[%c48, %c0_16], %26 {strides = array<i32>} : memref<128x512xbf16, #tpu.memory_space<vmem>>, vector<4x512xbf16>,
    %28 = vector.extract_strided_slice %1 {offsets = [0, 111], sizes = [4, 512], strides = [1, 1]} : vector<4x768xbf16> to vector<4x512xbf16>
    %c52 = arith.constant 52 : index
    %c0_17 = arith.constant 0 : index
    %29 = vector.load %arg6[%c52, %c0_17] : memref<128x512xbf16, #tpu.memory_space<vmem>>, vector<4x512xbf16>
    tpu.vector_store %arg6[%c52, %c0_17], %28 {strides = array<i32>} : memref<128x512xbf16, #tpu.memory_space<vmem>>, vector<4x512xbf16>,
    %30 = vector.extract_strided_slice %1 {offsets = [0, 112], sizes = [4, 512], strides = [1, 1]} : vector<4x768xbf16> to vector<4x512xbf16>
    %c56 = arith.constant 56 : index
    %c0_18 = arith.constant 0 : index
    %31 = vector.load %arg6[%c56, %c0_18] : memref<128x512xbf16, #tpu.memory_space<vmem>>, vector<4x512xbf16>
    tpu.vector_store %arg6[%c56, %c0_18], %30 {strides = array<i32>} : memref<128x512xbf16, #tpu.memory_space<vmem>>, vector<4x512xbf16>,
    %32 = vector.extract_strided_slice %1 {offsets = [0, 120], sizes = [4, 512], strides = [1, 1]} : vector<4x768xbf16> to vector<4x512xbf16>
    %c60 = arith.constant 60 : index
    %c0_19 = arith.constant 0 : index
    %33 = vector.load %arg6[%c60, %c0_19] : memref<128x512xbf16, #tpu.memory_space<vmem>>, vector<4x512xbf16>
    tpu.vector_store %arg6[%c60, %c0_19], %32 {strides = array<i32>} : memref<128x512xbf16, #tpu.memory_space<vmem>>, vector<4x512xbf16>,
    %34 = vector.extract_strided_slice %1 {offsets = [0, 121], sizes = [4, 512], strides = [1, 1]} : vector<4x768xbf16> to vector<4x512xbf16>
    %c64 = arith.constant 64 : index
    %c0_20 = arith.constant 0 : index
    %35 = vector.load %arg6[%c64, %c0_20] : memref<128x512xbf16, #tpu.memory_space<vmem>>, vector<4x512xbf16>
    tpu.vector_store %arg6[%c64, %c0_20], %34 {strides = array<i32>} : memref<128x512xbf16, #tpu.memory_space<vmem>>, vector<4x512xbf16>,
    %36 = vector.extract_strided_slice %1 {offsets = [0, 122], sizes = [4, 512], strides = [1, 1]} : vector<4x768xbf16> to vector<4x512xbf16>
    %c68 = arith.constant 68 : index
    %c0_21 = arith.constant 0 : index
    %37 = vector.load %arg6[%c68, %c0_21] : memref<128x512xbf16, #tpu.memory_space<vmem>>, vector<4x512xbf16>
    tpu.vector_store %arg6[%c68, %c0_21], %36 {strides = array<i32>} : memref<128x512xbf16, #tpu.memory_space<vmem>>, vector<4x512xbf16>,
    %38 = vector.extract_strided_slice %1 {offsets = [0, 200], sizes = [4, 512], strides = [1, 1]} : vector<4x768xbf16> to vector<4x512xbf16>
    %c72 = arith.constant 72 : index
    %c0_22 = arith.constant 0 : index
    %39 = vector.load %arg6[%c72, %c0_22] : memref<128x512xbf16, #tpu.memory_space<vmem>>, vector<4x512xbf16>
    tpu.vector_store %arg6[%c72, %c0_22], %38 {strides = array<i32>} : memref<128x512xbf16, #tpu.memory_space<vmem>>, vector<4x512xbf16>,
    %40 = vector.extract_strided_slice %1 {offsets = [0, 201], sizes = [4, 512], strides = [1, 1]} : vector<4x768xbf16> to vector<4x512xbf16>
    %c76 = arith.constant 76 : index
    %c0_23 = arith.constant 0 : index
    %41 = vector.load %arg6[%c76, %c0_23] : memref<128x512xbf16, #tpu.memory_space<vmem>>, vector<4x512xbf16>
    tpu.vector_store %arg6[%c76, %c0_23], %40 {strides = array<i32>} : memref<128x512xbf16, #tpu.memory_space<vmem>>, vector<4x512xbf16>,
    %42 = vector.extract_strided_slice %1 {offsets = [0, 202], sizes = [4, 512], strides = [1, 1]} : vector<4x768xbf16> to vector<4x512xbf16>
    %c80 = arith.constant 80 : index
    %c0_24 = arith.constant 0 : index
    %43 = vector.load %arg6[%c80, %c0_24] : memref<128x512xbf16, #tpu.memory_space<vmem>>, vector<4x512xbf16>
    tpu.vector_store %arg6[%c80, %c0_24], %42 {strides = array<i32>} : memref<128x512xbf16, #tpu.memory_space<vmem>>, vector<4x512xbf16>,
    %44 = vector.extract_strided_slice %1 {offsets = [0, 210], sizes = [4, 512], strides = [1, 1]} : vector<4x768xbf16> to vector<4x512xbf16>
    %c84 = arith.constant 84 : index
    %c0_25 = arith.constant 0 : index
    %45 = vector.load %arg6[%c84, %c0_25] : memref<128x512xbf16, #tpu.memory_space<vmem>>, vector<4x512xbf16>
    tpu.vector_store %arg6[%c84, %c0_25], %44 {strides = array<i32>} : memref<128x512xbf16, #tpu.memory_space<vmem>>, vector<4x512xbf16>,
    %46 = vector.extract_strided_slice %1 {offsets = [0, 211], sizes = [4, 512], strides = [1, 1]} : vector<4x768xbf16> to vector<4x512xbf16>
    %c88 = arith.constant 88 : index
    %c0_26 = arith.constant 0 : index
    %47 = vector.load %arg6[%c88, %c0_26] : memref<128x512xbf16, #tpu.memory_space<vmem>>, vector<4x512xbf16>
    tpu.vector_store %arg6[%c88, %c0_26], %46 {strides = array<i32>} : memref<128x512xbf16, #tpu.memory_space<vmem>>, vector<4x512xbf16>,
    %48 = vector.extract_strided_slice %1 {offsets = [0, 212], sizes = [4, 512], strides = [1, 1]} : vector<4x768xbf16> to vector<4x512xbf16>
    %c92 = arith.constant 92 : index
    %c0_27 = arith.constant 0 : index
    %49 = vector.load %arg6[%c92, %c0_27] : memref<128x512xbf16, #tpu.memory_space<vmem>>, vector<4x512xbf16>
    tpu.vector_store %arg6[%c92, %c0_27], %48 {strides = array<i32>} : memref<128x512xbf16, #tpu.memory_space<vmem>>, vector<4x512xbf16>,
    %50 = vector.extract_strided_slice %1 {offsets = [0, 220], sizes = [4, 512], strides = [1, 1]} : vector<4x768xbf16> to vector<4x512xbf16>
    %c96 = arith.constant 96 : index
    %c0_28 = arith.constant 0 : index
    %51 = vector.load %arg6[%c96, %c0_28] : memref<128x512xbf16, #tpu.memory_space<vmem>>, vector<4x512xbf16>
    tpu.vector_store %arg6[%c96, %c0_28], %50 {strides = array<i32>} : memref<128x512xbf16, #tpu.memory_space<vmem>>, vector<4x512xbf16>,
    %52 = vector.extract_strided_slice %1 {offsets = [0, 221], sizes = [4, 512], strides = [1, 1]} : vector<4x768xbf16> to vector<4x512xbf16>
    %c100 = arith.constant 100 : index
    %c0_29 = arith.constant 0 : index
    %53 = vector.load %arg6[%c100, %c0_29] : memref<128x512xbf16, #tpu.memory_space<vmem>>, vector<4x512xbf16>
    tpu.vector_store %arg6[%c100, %c0_29], %52 {strides = array<i32>} : memref<128x512xbf16, #tpu.memory_space<vmem>>, vector<4x512xbf16>,
    %54 = vector.extract_strided_slice %1 {offsets = [0, 222], sizes = [4, 512], strides = [1, 1]} : vector<4x768xbf16> to vector<4x512xbf16>
    %c104 = arith.constant 104 : index
    %c0_30 = arith.constant 0 : index
    %55 = vector.load %arg6[%c104, %c0_30] : memref<128x512xbf16, #tpu.memory_space<vmem>>, vector<4x512xbf16>
    tpu.vector_store %arg6[%c104, %c0_30], %54 {strides = array<i32>} : memref<128x512xbf16, #tpu.memory_space<vmem>>, vector<4x512xbf16>,
    %cst = arith.constant 0.000000e+00 : bf16
    %56 = vector.broadcast %cst : bf16 to vector<20x512xbf16>
    %c108 = arith.constant 108 : index
    %c0_31 = arith.constant 0 : index
    %57 = vector.load %arg6[%c108, %c0_31] : memref<128x512xbf16, #tpu.memory_space<vmem>>, vector<20x512xbf16>
    tpu.vector_store %arg6[%c108, %c0_31], %56 {strides = array<i32>} : memref<128x512xbf16, #tpu.memory_space<vmem>>, vector<20x512xbf16>,
    %c0_32 = arith.constant 0 : index
    %c0_33 = arith.constant 0 : index
    %58 = vector.load %arg3[%c0_32, %c0_33] : memref<8x128xbf16, #tpu.memory_space<vmem>>, vector<8x128xbf16>
    %c0_34 = arith.constant 0 : index
    %c0_35 = arith.constant 0 : index
    %59 = vector.load %arg6[%c0_34, %c0_35] : memref<128x512xbf16, #tpu.memory_space<vmem>>, vector<128x512xbf16>
    %cst_36 = arith.constant dense<0.000000e+00> : vector<8x512xf32>
    %60 = tpu.matmul %58, %59, %cst_36 {dimension_numbers = #tpu.dot_dimension_numbers<[1], [0], [0], [1], [0, 0, 1, 1], [], []>} : vector<8x128xbf16>, vector<128x512xbf16>, vector<8x512xf32> -> vector<8x512xf32>
    %c0_37 = arith.constant 0 : index
    %c0_38 = arith.constant 0 : index
    %61 = vector.load %arg4[%c0_37, %c0_38] : memref<8x1xf32, #tpu.memory_space<vmem>>, vector<8x1xf32>
    %62 = vector.broadcast %61 : vector<8x1xf32> to vector<8x512xf32>
    %63 = arith.addf %60, %62 : vector<8x512xf32>
    %cst_39 = arith.constant 0.000000e+00 : f32
    %64 = vector.broadcast %cst_39 : f32 to vector<8x512xf32>
    %65 = arith.maximumf %63, %64 : vector<8x512xf32>
    %66 = vector.shape_cast %65 : vector<8x512xf32> to vector<1x8x512xf32>
    %c0_40 = arith.constant 0 : index
    %c0_41 = arith.constant 0 : index
    %c0_42 = arith.constant 0 : index
    %67 = vector.load %arg5[%c0_40, %c0_41, %c0_42] : memref<1x8x512xf32, #tpu.memory_space<vmem>>, vector<1x8x512xf32>
    tpu.vector_store %arg5[%c0_40, %c0_41, %c0_42], %66 {strides = array<i32>} : memref<1x8x512xf32, #tpu.memory_space<vmem>>, vector<1x8x512xf32>,
    return
  }
  func.func @transform_0(%arg0: i32, %arg1: i32) -> (i32, i32, i32, i32) {
    %c0_i32 = arith.constant 0 : i32
    %c0_i32_0 = arith.constant 0 : i32
    %c0_i32_1 = arith.constant 0 : i32
    return %arg0, %arg1, %c0_i32, %c0_i32_0 : i32, i32, i32, i32
  }
  func.func @transform_1(%arg0: i32, %arg1: i32) -> (i32, i32) {
    %c0_i32 = arith.constant 0 : i32
    %c0_i32_0 = arith.constant 0 : i32
    %c0_i32_1 = arith.constant 0 : i32
    return %c0_i32, %c0_i32_0 : i32, i32
  }
  func.func @transform_2(%arg0: i32, %arg1: i32) -> (i32, i32) {
    %c0_i32 = arith.constant 0 : i32
    %c0_i32_0 = arith.constant 0 : i32
    %c0_i32_1 = arith.constant 0 : i32
    return %c0_i32, %c0_i32_0 : i32, i32
  }
  func.func @transform_3(%arg0: i32, %arg1: i32) -> (i32, i32, i32) {
    %c0_i32 = arith.constant 0 : i32
    %c0_i32_0 = arith.constant 0 : i32
    return %arg0, %c0_i32, %arg1 : i32, i32, i32
  }
}

</mosaic_0001>

<bundles_post_ra>
// kernel: tpu_custom_call.1
= control target key start
LH: loop header
LB: loop body
LE: loop exit
PB: predicated region body
PF: predicated region fallthrough
CT: control target
= control target key end

     0   :  { %8 = vsyncpa [#allocation4], 0  ;;  %s2232_s0 = inlined_call_operand.hbm [shape: bf16[2,2,4,768], index: 0, kind: input, shape index: {}]   ;;  %s2233_s1 = inlined_call_operand.vmem [shape: bf16[8,128], index: 1, kind: input, shape index: {}]   ;;  %s2234_s2 = inlined_call_operand.vmem [shape: f32[8,1], index: 2, kind: input, shape index: {}]   ;;  %s2235_s3 = inlined_call_operand.hbm [shape: f32[2,8,1024], index: 3, kind: output, shape index: {}]  }
   0x1   :  { %10 = vsyncpa [#allocation4 + $0x1], 0 }
   0x2   :  { %11 = vsyncpa [#allocation5], 0 }
   0x3   :  { %13 = vsyncpa [#allocation5 + $0x1], 0  ;;  %s1767_s12 = smov 0   ;;  %s1769_s13 = smov 0  }
   0x4   :  { %s1771_s14 = smov 0   ;;  %s1773_s15 = smov 0  }
   0x5   :  { %s1775_s16 = smov 0   ;;  %s1777_s17 = smov 0  }
   0x6   :  { %s1779_s18 = smov 0   ;;  %s1781_s19 = smov 0  }
   0x7 LB: > { %s1307_s20 = sadd.s32 4294967295, %s1718_s19   ;;  %s1308_s21 = sadd.s32 4294967294, %s1718_s19   ;;  %s1718_s19 = sphi %s1781_s19, %s19_s19   ;;  %s1714_s18 = sphi %s1779_s18, %s2250_s18   ;;  %s1710_s17 = sphi %s1777_s17, %s2249_s17   ;;  %s1706_s16 = sphi %s1775_s16, %s2248_s16   ;;  %s1702_s15 = sphi %s1773_s15, %s2247_s15   ;;  %s1698_s14 = sphi %s1771_s14, %s2246_s14   ;;  %s1694_s13 = sphi %s1769_s13, %s2245_s13   ;;  %s1690_s12 = sphi %s1767_s12, %s2244_s12  }
   0x8   : > { %s28_s22 = sadd.s32 1, %s1710_s17  ;;  %s31_s23 = sadd.s32 1, %s1714_s18 }
   0x9   : > { %p29_p0 = scmp.ge.s32.totalorder %s28_s22, 2  ;;  %s40_s24 = sadd.s32 1, %s1698_s14 }
   0xa   : > { %p47_p1 = scmp.ne.s32.totalorder %s1698_s14, %s1694_s13  ;;  %p48_p2 = scmp.eq.s32.totalorder %s1718_s19, 0 }
   0xb   : > { %s2252_s22 = smov (%p29_p0, %s28_s22), 0  ;;  %s2254_s23 = smov (!%p29_p0, %s31_s23), %s1714_s18 }
   0xc   : > { %s36_s25 = ssub.s32 %s1710_s17, %s2252_s22  ;;  %p1820_p3 = por %p48_p2, %p47_p1 }
   0xd   : > { %p33_p4 = scmp.ge.s32.totalorder %s2254_s23, 2  ;;  %p53_p5 = scmp.ne.s32.totalorder %s1694_s13, %s1690_s12 }
   0xe   : > { %p54_p6 = scmp.eq.s32.totalorder %s1307_s20, 0  ;;  %p121_p7 = scmp.eq.s32.totalorder %s1307_s20, 3 }
   0xf   : > { %s2256_s23 = smov (%p33_p4, %s2254_s23), 0  ;;  %p127_p10 = scmp.eq.s32.totalorder %s1308_s21, 3 }
  0x10   : > { %2238 = sst [smem:[#allocation9_spill]] %s2256_s23  ;;  %p1828_p8 = por %p54_p6, %p53_p5 }
  0x11   : > { %p1832_p9 = por %p121_p7, %p47_p1  ;;  %s35_s29 = ssub.s32 %s1714_s18, %s2256_s23 }
  0x12   : > { %s37_s30 = sor.u32 %s36_s25, %s35_s29  ;;  %p1838_p12 = por %p127_p10, %p53_p5 }
  0x13   : > { %p38_p11 = scmp.eq.s32.totalorder %s37_s30, 0  ;;  %p1496_p13 = scmp.lt.s32.totalorder %s1718_s19, 4 }
  0x14   : > { %s153_s5 = sand.u32 1, %s1698_s14   ;;  %s1481_s8 = smul.u32 6, %s1710_s17 }
  0x15   : > { %s1845_s6 = scalar_select %p38_p11, %s1698_s14, %s40_s24  }
  0x16   : > { %s1480_s7 = smul.u32 12, %s153_s5  ;;  %p1850_p0 = pnand %p1496_p13, %p1820_p3 }
  0x17   : > { %s1482_s10 = smul.u32 12, %s1714_s18  ;;  %p1312_p1 = scmp.ge.s32.totalorder %s1718_s19, 1 }
  0x18   : > { %s157_s11 = scalar_lea.vmem [#allocation3], %s1480_s7  ;;  %p173_p2 = scmp.lt.s32.totalorder %s1718_s19, 5 }
  0x19   : > { %s168_s20 = sshll.u32 %s157_s11, 4  ;;  %s162_s21 = sadd.s32 %s1482_s10, %s1481_s8  ;;  %s169_s20 = int_to_ptr.vmem [resolvable:$true] %s168_s20 }
  0x1a   : > { %s1311_s25 = sshll.u32 %s162_s21, 1  ;;  %p174_p4 = pnand %p1312_p1, %p173_p2 }
  0x1b   : > { %s164_s24 = scalar_lea.hbm %s2232_s0, %s1311_s25  ;;  %s154_s26 = scalar_lea.sflag [#allocation4], %s153_s5 }
  0x1c   : > { %s166_s23 = sshll.u32 %s164_s24, 4  ;;  %177 = sbr.rel (%p174_p4) target bundleno = 563 (0x233), region = 32  ;;  %s167_s23 = int_to_ptr.hbm [resolvable:$true] %s166_s23 }
  0x1d   : > { %1491 = dma.hbm_to_vmem [thread:$0]  (!%p1850_p0), %s167_s23, 192, %s169_s20, %s154_s26  }
  0x1e   : > { %s1863_s7 = sand.u32 (!%p174_p4), 1, %s1694_s13  }
  0x1f   : > { %s1483_s8 = smul.u32 (!%p174_p4), 12, %s1863_s7  ;;  %s180_s10 = scalar_lea.sflag (!%p174_p4), [#allocation4], %s1863_s7 }
  0x21   : > { %s183_s11 = scalar_lea.vmem [#allocation3], %s1483_s8 }
  0x22   : > { %1681 = dma.done.wait (%p1828_p8), %s180_s10, 192  }
  0x23   : > { %1683 = vsyncadd (%p1828_p8), %s180_s10, 4294967104  ;;  %v1871_v0 = vld [vmem:[%s183_s11] sm:$0xff]  ;;  %v1873_v1 = vld [vmem:[%s183_s11 + $0x8] sm:$0xf]  ;;  %s1720_s23 = smov 127   ;;  %s1721_s27 = smov 126  }
  0x24   : > { %212 = vst [vmem:[#allocation1] ss:$2 sm:$0xff] %v1871_v0  ;;  %s1722_s5 = smov 118   ;;  %s1723_s9 = smov 117   ;;  %vm268_vm0 = vcmask 1031168   ;;  %vm239_vm1 = vcmask 1043456  }
  0x25   : > { %223 = vst [vmem:[#allocation1 + $0x11] ss:$2 sm:$0xff] %v1873_v1  ;;  %s1724_s20 = smov 116   ;;  %s1725_s21 = smov 108   ;;  %vm241_vm2 = vcmask 1039360   ;;  %vm323_vm3 = vcmask 957440  }
  0x26   : > { %s1726_s25 = smov 106   ;;  %s1727_s29 = smov 28   ;;  %vm351_vm4 = vcmask 949248   ;;  %vm378_vm5 = vcmask 883712   ;;  %vm433_vm6 = vcmask 867328   ;;  %vm461_vm7 = vcmask 228352  }
  0x27   : > { %s1728_s30 = smov 27   ;;  %s1729_s24 = smov 26   ;;  %vm488_vm8 = vcmask 220160   ;;  %vm516_vm9 = vcmask 211968   ;;  %vm543_vm10 = vcmask 146432   ;;  %vm571_vm11 = vcmask 138240  }
  0x28   : > { %s1730_s26 = smov 18   ;;  %s1731_s8 = smov 17   ;;  %vm598_vm12 = vcmask 130048   ;;  %vm626_vm13 = vcmask 64512   ;;  %vm653_vm14 = vcmask 56320   ;;  %vm681_vm15 = vcmask 48128  }
  0x29   : > { %s1732_s10 = smov 16   ;;  %s1733_s11 = smov 8  }
  0x2b   : > { %v213_v2 = vld.sshfl [vmem:[#allocation1] sm:$0xff pattern:$0x75643120]  ;;  %v214_v3 = vld.sshfl [vmem:[#allocation1 + $0x8] sm:$0xff pattern:$0x75643120] }
  0x2c   : > { %220 = vst [vmem:[#allocation1 + $0x1] ss:$2 sm:$0xff] %v1871_v0  ;;  %v228_v4 = vld.sshfl [vmem:[#allocation1 + $0x10] sm:$0xff pattern:$0x75643120] }
  0x2d   : > { %217 = vst [vmem:[#allocation2] sm:$0x33] %v213_v2  ;;  %234 = vrot.lane.b32.xlu1 %v228_v4, %s1720_s23 }
  0x2e   : > { %218 = vst [vmem:[#allocation2 + $0x8] sm:$0x33] %v214_v3 }
  0x2f   : > { %251 = vst [vmem:[#allocation1 + $0x10] ss:$2 sm:$0xff] %v1873_v1 }
  0x33   : > { %v224_v5 = vld.sshfl [vmem:[#allocation1] sm:$0xff pattern:$0x75643120]  ;;  %v226_v6 = vld.sshfl [vmem:[#allocation1 + $0x8] sm:$0xff pattern:$0x75643120] }
  0x34   : > { %230 = vrot.lane.b32.xlu0 %v224_v5, %s1720_s23  ;;  %249 = vst [vmem:[#allocation1] ss:$2 sm:$0xff] %v1871_v0 }
  0x36   : > { %v256_v7 = vld.sshfl [vmem:[#allocation1 + $0x10] sm:$0xff pattern:$0x75643120] }
  0x37   : > { %262 = vrot.lane.b32.xlu2 %v256_v7, %s1721_s27  ;;  %279 = vst [vmem:[#allocation1 + $0x11] ss:$2 sm:$0xff] %v1873_v1 }
  0x3b   : > { %v252_v8 = vld.sshfl [vmem:[#allocation1] sm:$0xff pattern:$0x75643120]  ;;  %v254_v9 = vld.sshfl [vmem:[#allocation1 + $0x8] sm:$0xff pattern:$0x75643120] }
  0x3c   : > { %232 = vrot.lane.b32.xlu0 %v226_v6, %s1720_s23  ;;  %277 = vst [vmem:[#allocation1 + $0x1] ss:$2 sm:$0xff] %v1871_v0  ;;  %258 = vrot.lane.b32.xlu1 %v252_v8, %s1721_s27  ;;  %s1734_s23 = smov 7  }
  0x3e   : > { %v1882_v10 = vld.sshfl [vmem:[#allocation1 + $0x10] sm:$0xff pattern:$0x75643120] }
  0x3f   : > { %260 = vrot.lane.b32.xlu2 %v254_v9, %s1721_s27  ;;  %306 = vst [vmem:[#allocation1 + $0x10] ss:$2 sm:$0xff] %v1873_v1  ;;  %s1735_s27 = smov 6  }
  0x43   : > { %v280_v11 = vld.sshfl [vmem:[#allocation1] sm:$0xff pattern:$0x75643120]  ;;  %v1885_v12 = vld.sshfl [vmem:[#allocation1 + $0x8] sm:$0xff pattern:$0x75643120] }
  0x44   : > { %286 = vrot.lane.b32.xlu0 %v280_v11, %s1722_s5  ;;  %304 = vst [vmem:[#allocation1] ss:$2 sm:$0xff] %v1871_v0 }
  0x46   : > { %v311_v13 = vld.sshfl [vmem:[#allocation1 + $0x10] sm:$0xff pattern:$0x75643120] }
  0x47   : > { %317 = vrot.lane.b32.xlu1 %v311_v13, %s1723_s9  ;;  %334 = vst [vmem:[#allocation1 + $0x11] ss:$2 sm:$0xff] %v1873_v1 }
  0x4b   : > { %v309_v14 = vld.sshfl [vmem:[#allocation1 + $0x8] sm:$0xff pattern:$0x75643120]  ;;  %v1891_v15 = vld.sshfl [vmem:[#allocation1] sm:$0xff pattern:$0x75643120] }
  0x4c   : > { %315 = vrot.lane.b32.xlu0 %v309_v14, %s1723_s9  ;;  %332 = vst [vmem:[#allocation1 + $0x1] ss:$2 sm:$0xff] %v1871_v0 }
  0x4e   : > { %v339_v16 = vld.sshfl [vmem:[#allocation1 + $0x10] sm:$0xff pattern:$0x75643120] }
  0x4f   : > { %361 = vst [vmem:[#allocation1 + $0x10] ss:$2 sm:$0xff] %v1873_v1 }
  0x53   : > { %v337_v17 = vld.sshfl [vmem:[#allocation1 + $0x8] sm:$0xff pattern:$0x75643120]  ;;  %v1896_v18 = vld.sshfl [vmem:[#allocation1] sm:$0xff pattern:$0x75643120] }
  0x54   : > { %345 = vrot.lane.b32.xlu0 %v339_v16, %s1724_s20  ;;  %343 = vrot.lane.b32.xlu2 %v337_v17, %s1724_s20  ;;  %359 = vst [vmem:[#allocation1] ss:$2 sm:$0xff] %v1871_v0 }
  0x56   : > { %v366_v19 = vld.sshfl [vmem:[#allocation1 + $0x10] sm:$0xff pattern:$0x75643120] }
  0x57   : > { %389 = vst [vmem:[#allocation1 + $0x11] ss:$2 sm:$0xff] %v1873_v1 }
  0x5b   : > { %v364_v20 = vld.sshfl [vmem:[#allocation1 + $0x8] sm:$0xff pattern:$0x75643120]  ;;  %v1902_v21 = vld.sshfl [vmem:[#allocation1] sm:$0xff pattern:$0x75643120] }
  0x5c   : > { %370 = vrot.lane.b32.xlu1 %v364_v20, %s1725_s21  ;;  %387 = vst [vmem:[#allocation1 + $0x1] ss:$2 sm:$0xff] %v1871_v0  ;;  %372 = vrot.lane.b32.xlu2 %v366_v19, %s1725_s21 }
  0x5e   : > { %v1907_v22 = vld.sshfl [vmem:[#allocation1 + $0x10] sm:$0xff pattern:$0x75643120] }
  0x5f   : > { %416 = vst [vmem:[#allocation1 + $0x10] ss:$2 sm:$0xff] %v1873_v1 }
  0x63   : > { %v1910_v23 = vld.sshfl [vmem:[#allocation1] sm:$0xff pattern:$0x75643120]  ;;  %v1912_v24 = vld.sshfl [vmem:[#allocation1 + $0x8] sm:$0xff pattern:$0x75643120] }
  0x64   : > { %414 = vst [vmem:[#allocation1] ss:$2 sm:$0xff] %v1871_v0 }
  0x66   : > { %v421_v25 = vld.sshfl [vmem:[#allocation1 + $0x10] sm:$0xff pattern:$0x75643120] }
  0x67   : > { %427 = vrot.lane.b32.xlu1 %v421_v25, %s1726_s25  ;;  %444 = vst [vmem:[#allocation1 + $0x11] ss:$2 sm:$0xff] %v1873_v1 }
  0x6b   : > { %v419_v26 = vld.sshfl [vmem:[#allocation1 + $0x8] sm:$0xff pattern:$0x75643120]  ;;  %v1917_v27 = vld.sshfl [vmem:[#allocation1] sm:$0xff pattern:$0x75643120] }
  0x6c   : > { %425 = vrot.lane.b32.xlu0 %v419_v26, %s1726_s25  ;;  %442 = vst [vmem:[#allocation1 + $0x1] ss:$2 sm:$0xff] %v1871_v0 }
  0x6e   : > { %v449_v28 = vld.sshfl [vmem:[#allocation1 + $0x10] sm:$0xff pattern:$0x75643120] }
  0x6f   : > { %471 = vst [vmem:[#allocation1 + $0x10] ss:$2 sm:$0xff] %v1873_v1 }
  0x73   : > { %v1922_v29 = vld.sshfl [vmem:[#allocation1] sm:$0xff pattern:$0x75643120]  ;;  %v447_v30 = vld.sshfl [vmem:[#allocation1 + $0x8] sm:$0xff pattern:$0x75643120] }
  0x74   : > { %455 = vrot.lane.b32.xlu0 %v449_v28, %s1727_s29  ;;  %453 = vrot.lane.b32.xlu2 %v447_v30, %s1727_s29  ;;  %469 = vst [vmem:[#allocation1] ss:$2 sm:$0xff] %v1871_v0 }
  0x76   : > { %v476_v31 = vld.sshfl [vmem:[#allocation1 + $0x10] sm:$0xff pattern:$0x75643120] }
  0x77   : > { %499 = vst [vmem:[#allocation1 + $0x11] ss:$2 sm:$0xff] %v1873_v1 }
  0x7b   : > { %v1928_v32 = vld.sshfl [vmem:[#allocation1] sm:$0xff pattern:$0x75643120]  ;;  %v474_v33 = vld.sshfl [vmem:[#allocation1 + $0x8] sm:$0xff pattern:$0x75643120] }
  0x7c   : > { %480 = vrot.lane.b32.xlu1 %v474_v33, %s1728_s30  ;;  %497 = vst [vmem:[#allocation1 + $0x1] ss:$2 sm:$0xff] %v1871_v0  ;;  %482 = vrot.lane.b32.xlu2 %v476_v31, %s1728_s30 }
  0x7e   : > { %v504_v34 = vld.sshfl [vmem:[#allocation1 + $0x10] sm:$0xff pattern:$0x75643120] }
  0x7f   : > { %526 = vst [vmem:[#allocation1 + $0x10] ss:$2 sm:$0xff] %v1873_v1 }
  0x83   : > { %v1934_v35 = vld.sshfl [vmem:[#allocation1] sm:$0xff pattern:$0x75643120]  ;;  %v502_v36 = vld.sshfl [vmem:[#allocation1 + $0x8] sm:$0xff pattern:$0x75643120] }
  0x84   : > { %510 = vrot.lane.b32.xlu1 %v504_v34, %s1729_s24  ;;  %508 = vrot.lane.b32.xlu0 %v502_v36, %s1729_s24  ;;  %524 = vst [vmem:[#allocation1] ss:$2 sm:$0xff] %v1871_v0 }
  0x86   : > { %v531_v37 = vld.sshfl [vmem:[#allocation1 + $0x10] sm:$0xff pattern:$0x75643120] }
  0x87   : > { %554 = vst [vmem:[#allocation1 + $0x11] ss:$2 sm:$0xff] %v1873_v1 }
  0x8b   : > { %v529_v38 = vld.sshfl [vmem:[#allocation1 + $0x8] sm:$0xff pattern:$0x75643120]  ;;  %v527_v39 = vld.sshfl [vmem:[#allocation1] sm:$0xff pattern:$0x75643120] }
  0x8c   : > { %535 = vrot.lane.b32.xlu0 %v529_v38, %s1730_s26  ;;  %533 = vrot.lane.b32.xlu2 %v527_v39, %s1730_s26  ;;  %552 = vst [vmem:[#allocation1 + $0x1] ss:$2 sm:$0xff] %v1871_v0 }
  0x8d   : > { %537 = vrot.lane.b32.xlu1 %v531_v37, %s1730_s26  ;;  %s1736_s26 = smov 56  }
  0x8e   : > { %v559_v40 = vld.sshfl [vmem:[#allocation1 + $0x10] sm:$0xff pattern:$0x75643120] }
  0x8f   : > { %581 = vst [vmem:[#allocation1 + $0x10] ss:$2 sm:$0xff] %v1873_v1 }
  0x91   : > { %v263_v43 = vpop.permute.xlu2 %262 }
  0x92   : > { %v266_v47 = vrot.slane %v263_v43, 4 }
  0x93   : > { %v557_v41 = vld.sshfl [vmem:[#allocation1 + $0x8] sm:$0xff pattern:$0x75643120]  ;;  %v555_v42 = vld.sshfl [vmem:[#allocation1] sm:$0xff pattern:$0x75643120] }
  0x94   : > { %565 = vrot.lane.b32.xlu0 %v559_v40, %s1731_s8  ;;  %563 = vrot.lane.b32.xlu2 %v557_v41, %s1731_s8  ;;  %579 = vst [vmem:[#allocation1] ss:$2 sm:$0xff] %v1871_v0 }
  0x96   : > { %v586_v44 = vld.sshfl [vmem:[#allocation1 + $0x10] sm:$0xff pattern:$0x75643120] }
  0x97   : > { %609 = vst [vmem:[#allocation1 + $0x11] ss:$2 sm:$0xff] %v1873_v1 }
  0x99   : > { %v261_v48 = vpop.permute.xlu2 %260 }
  0x9a   : > { %v265_v50 = vrot.slane %v261_v48, 4 }
  0x9b   : > { %v584_v45 = vld.sshfl [vmem:[#allocation1 + $0x8] sm:$0xff pattern:$0x75643120]  ;;  %v582_v46 = vld.sshfl [vmem:[#allocation1] sm:$0xff pattern:$0x75643120] }
  0x9c   : > { %592 = vrot.lane.b32.xlu2 %v586_v44, %s1732_s10  ;;  %561 = vrot.lane.b32.xlu0 %v555_v42, %s1731_s8  ;;  %607 = vst [vmem:[#allocation1 + $0x1] ss:$2 sm:$0xff] %v1871_v0  ;;  %v270_v51 = vsel %vm239_vm1, %v265_v50, %v266_v47  ;;  %s1737_s8 = smov 55  }
  0x9d   : > { %590 = vrot.lane.b32.xlu1 %v584_v45, %s1732_s10  ;;  %v271_v52 = vsel %vm268_vm0, %v261_v48, %v270_v51 }
  0x9e   : > { %v614_v49 = vld.sshfl [vmem:[#allocation1 + $0x10] sm:$0xff pattern:$0x75643120]  ;;  %275 = vst [vmem:[#allocation2 + $0x18] sm:$0x33] %v271_v52 }
  0x9f   : > { %636 = vst [vmem:[#allocation1 + $0x10] ss:$2 sm:$0xff] %v1873_v1  ;;  %v235_v57 = vpop.permute.xlu1 %234 }
  0xa0   : > { %v238_v61 = vrot.slane %v235_v57, 4 }
  0xa3   : > { %v612_v53 = vld.sshfl [vmem:[#allocation1 + $0x8] sm:$0xff pattern:$0x75643120]  ;;  %v610_v54 = vld.sshfl [vmem:[#allocation1] sm:$0xff pattern:$0x75643120] }
  0xa4   : > { %618 = vrot.lane.b32.xlu0 %v612_v53, %s1733_s11  ;;  %616 = vrot.lane.b32.xlu2 %v610_v54, %s1733_s11  ;;  %634 = vst [vmem:[#allocation1] ss:$2 sm:$0xff] %v1871_v0 }
  0xa5   : > { %620 = vrot.lane.b32.xlu1 %v614_v49, %s1733_s11  ;;  %s1739_s11 = smov 46  }
  0xa6   : > { %v641_v55 = vld.sshfl [vmem:[#allocation1 + $0x10] sm:$0xff pattern:$0x75643120]  ;;  %v231_v56 = vpop.permute.xlu0 %230 }
  0xa7   : > { %664 = vst [vmem:[#allocation1 + $0x11] ss:$2 sm:$0xff] %v1873_v1  ;;  %v236_v60 = vrot.slane %v231_v56, 4 }
  0xab   : > { %v639_v58 = vld.sshfl [vmem:[#allocation1 + $0x8] sm:$0xff pattern:$0x75643120]  ;;  %v637_v59 = vld.sshfl [vmem:[#allocation1] sm:$0xff pattern:$0x75643120] }
  0xac   : > { %645 = vrot.lane.b32.xlu0 %v639_v58, %s1734_s23  ;;  %643 = vrot.lane.b32.xlu2 %v637_v59, %s1734_s23  ;;  %662 = vst [vmem:[#allocation1 + $0x1] ss:$2 sm:$0xff] %v1871_v0 }
  0xad   : > { %588 = vrot.lane.b32.xlu1 %v582_v46, %s1732_s10  ;;  %s1738_s10 = smov 54  }
  0xae   : > { %v669_v62 = vld.sshfl [vmem:[#allocation1 + $0x10] sm:$0xff pattern:$0x75643120]  ;;  %v233_v63 = vpop.permute.xlu0 %232  ;;  %v259_v3 = vpop.permute.xlu1 %258 }
  0xaf   : > { %691 = vst [vmem:[#allocation1 + $0x10] ss:$2 sm:$0xff] %v1873_v1  ;;  %v237_v2 = vrot.slane %v233_v63, 4  ;;  %v264_v4 = vrot.slane %v259_v3, 4  ;;  %v1966_v30 = vpop.permute.xlu2 %343 }
  0xb0   : > { %v348_v39 = vrot.slane %v1966_v30, 4 }
  0xb1   : > { %v240_v5 = vsel %vm239_vm1, %v236_v60, %v237_v2  ;;  %v243_v6 = vsel %vm239_vm1, %v237_v2, %v238_v61  ;;  %v267_v8 = vsel %vm239_vm1, %v264_v4, %v265_v50 }
  0xb2   : > { %v242_v7 = vsel %vm241_vm2, %v231_v56, %v240_v5  ;;  %v244_v13 = vsel %vm241_vm2, %v233_v63, %v243_v6  ;;  %v269_v14 = vsel %vm268_vm0, %v259_v3, %v267_v8  ;;  %vm708_vm0 = vcmask 457728  }
  0xb3   : > { %v667_v9 = vld.sshfl [vmem:[#allocation1 + $0x8] sm:$0xff pattern:$0x75643120]  ;;  %v665_v11 = vld.sshfl [vmem:[#allocation1] sm:$0xff pattern:$0x75643120] }
  0xb4   : > { %675 = vrot.lane.b32.xlu0 %v669_v62, %s1735_s27  ;;  %673 = vrot.lane.b32.xlu2 %v667_v9, %s1735_s27  ;;  %689 = vst [vmem:[#allocation1] ss:$2 sm:$0xff] %v1871_v0  ;;  %vm736_vm2 = vcmask 449536  }
  0xb5   : > { %647 = vrot.lane.b32.xlu1 %v641_v55, %s1734_s23  ;;  %247 = vst [vmem:[#allocation2] sm:$0xcc] %v242_v7  ;;  %s1740_s23 = smov 45  }
  0xb6   : > { %v696_v16 = vld.sshfl [vmem:[#allocation1 + $0x10] sm:$0xff pattern:$0x75643120]  ;;  %248 = vst [vmem:[#allocation2 + $0x8] sm:$0xcc] %v244_v13  ;;  %v1960_v17 = vpop.permute.xlu0 %286 }
  0xb7   : > { %719 = vst [vmem:[#allocation1 + $0x11] ss:$2 sm:$0xff] %v1873_v1  ;;  %v373_v43 = vpop.permute.xlu2 %372 }
  0xb8   : > { %274 = vst [vmem:[#allocation2 + $0x10] sm:$0x33] %v269_v14  ;;  %v376_v48 = vrot.slane %v373_v43, 4 }
  0xb9   : > { %v318_v25 = vpop.permute.xlu1 %317 }
  0xba   : > { %v321_v26 = vrot.slane %v318_v25, 4 }
  0xbb   : > { %v694_v19 = vld.sshfl [vmem:[#allocation1 + $0x8] sm:$0xff pattern:$0x75643120]  ;;  %v692_v20 = vld.sshfl [vmem:[#allocation1] sm:$0xff pattern:$0x75643120] }
  0xbc   : > { %702 = vrot.lane.b32.xlu2 %v696_v16, %s1736_s26  ;;  %671 = vrot.lane.b32.xlu0 %v665_v11, %s1735_s27  ;;  %717 = vst [vmem:[#allocation1 + $0x1] ss:$2 sm:$0xff] %v1871_v0  ;;  %s1741_s27 = smov 44  }
  0xbd   : > { %700 = vrot.lane.b32.xlu1 %v694_v19, %s1736_s26 }
  0xbe   : > { %v724_v28 = vld.sshfl [vmem:[#allocation1 + $0x10] sm:$0xff pattern:$0x75643120]  ;;  %v1968_v31 = vpop.permute.xlu0 %315 }
  0xbf   : > { %746 = vst [vmem:[#allocation1 + $0x10] ss:$2 sm:$0xff] %v1873_v1  ;;  %v320_v33 = vrot.slane %v1968_v31, 4 }
  0xc1   : > { %v325_v34 = vsel %vm239_vm1, %v320_v33, %v321_v26 }
  0xc2   : > { %v326_v36 = vsel %vm323_vm3, %v1968_v31, %v325_v34 }
  0xc3   : > { %v722_v37 = vld.sshfl [vmem:[#allocation1 + $0x8] sm:$0xff pattern:$0x75643120]  ;;  %v720_v38 = vld.sshfl [vmem:[#allocation1] sm:$0xff pattern:$0x75643120] }
  0xc4   : > { %728 = vrot.lane.b32.xlu0 %v722_v37, %s1737_s8  ;;  %744 = vst [vmem:[#allocation1] ss:$2 sm:$0xff] %v1871_v0 }
  0xc5   : > { %730 = vrot.lane.b32.xlu1 %v724_v28, %s1737_s8  ;;  %330 = vst [vmem:[#allocation2 + $0x28] sm:$0x33] %v326_v36 }
  0xc6   : > { %v751_v40 = vld.sshfl [vmem:[#allocation1 + $0x10] sm:$0xff pattern:$0x75643120]  ;;  %v346_v41 = vpop.permute.xlu0 %345 }
  0xc7   : > { %757 = vrot.lane.b32.xlu2 %v751_v40, %s1738_s10  ;;  %774 = vst [vmem:[#allocation1 + $0x11] ss:$2 sm:$0xff] %v1873_v1  ;;  %v349_v42 = vrot.slane %v346_v41, 4 }
  0xc9   : > { %v353_v44 = vsel %vm239_vm1, %v348_v39, %v349_v42 }
  0xca   : > { %v354_v45 = vsel %vm351_vm4, %v1966_v30, %v353_v44 }
  0xcb   : > { %v749_v46 = vld.sshfl [vmem:[#allocation1 + $0x8] sm:$0xff pattern:$0x75643120]  ;;  %v747_v47 = vld.sshfl [vmem:[#allocation1] sm:$0xff pattern:$0x75643120] }
  0xcc   : > { %772 = vst [vmem:[#allocation1 + $0x1] ss:$2 sm:$0xff] %v1871_v0 }
  0xcd   : > { %698 = vrot.lane.b32.xlu1 %v692_v20, %s1736_s26  ;;  %358 = vst [vmem:[#allocation2 + $0x28] sm:$0xcc] %v354_v45  ;;  %s1742_s26 = smov 36  }
  0xce   : > { %v779_v49 = vld.sshfl [vmem:[#allocation1 + $0x10] sm:$0xff pattern:$0x75643120]  ;;  %v1988_v50 = vpop.permute.xlu1 %370  ;;  %v1995_v53 = vpop.permute.xlu2 %453 }
  0xcf   : > { %726 = vrot.lane.b32.xlu2 %v720_v38, %s1737_s8  ;;  %801 = vst [vmem:[#allocation1 + $0x10] ss:$2 sm:$0xff] %v1873_v1  ;;  %v375_v51 = vrot.slane %v1988_v50, 4  ;;  %v458_v8 = vrot.slane %v1995_v53, 4  ;;  %s1743_s8 = smov 35  }
  0xd1   : > { %v380_v52 = vsel %vm239_vm1, %v375_v51, %v376_v48 }
  0xd2   : > { %v381_v54 = vsel %vm378_vm5, %v1988_v50, %v380_v52  ;;  %v942_v50 = vld [vmem:[%s2233_s1] sm:$0xf] }
  0xd3   : > { %v777_v55 = vld.sshfl [vmem:[#allocation1 + $0x8] sm:$0xff pattern:$0x75643120]  ;;  %v775_v56 = vld.sshfl [vmem:[#allocation1] sm:$0xff pattern:$0x75643120] }
  0xd4   : > { %783 = vrot.lane.b32.xlu0 %v777_v55, %s1739_s11  ;;  %799 = vst [vmem:[#allocation1] ss:$2 sm:$0xff] %v1871_v0 }
  0xd5   : > { %755 = vrot.lane.b32.xlu1 %v749_v46, %s1738_s10  ;;  %385 = vst [vmem:[#allocation2 + $0x38] sm:$0x33] %v381_v54 }
  0xd6   : > { %v806_v57 = vld.sshfl [vmem:[#allocation1 + $0x10] sm:$0xff pattern:$0x75643120]  ;;  %v483_v60 = vpop.permute.xlu2 %482 }
  0xd7   : > { %753 = vrot.lane.b32.xlu2 %v747_v47, %s1738_s10  ;;  %829 = vst [vmem:[#allocation1 + $0x11] ss:$2 sm:$0xff] %v1873_v1  ;;  %v486_v26 = vrot.slane %v483_v60, 4  ;;  %s1744_s10 = smov 34  }
  0xd9   : > { %v428_v61 = vpop.permute.xlu1 %427 }
  0xda   : > { %v431_v62 = vrot.slane %v428_v61, 4 }
  0xdb   : > { %v804_v58 = vld.sshfl [vmem:[#allocation1 + $0x8] sm:$0xff pattern:$0x75643120]  ;;  %v802_v59 = vld.sshfl [vmem:[#allocation1] sm:$0xff pattern:$0x75643120] }
  0xdc   : > { %812 = vrot.lane.b32.xlu0 %v806_v57, %s1740_s23  ;;  %827 = vst [vmem:[#allocation1 + $0x1] ss:$2 sm:$0xff] %v1871_v0 }
  0xdd   : > { %785 = vrot.lane.b32.xlu1 %v779_v49, %s1739_s11 }
  0xde   : > { %v2004_v63 = vpop.permute.xlu0 %425  ;;  %v834_v2 = vld.sshfl [vmem:[#allocation1 + $0x10] sm:$0xff pattern:$0x75643120] }
  0xdf   : > { %810 = vrot.lane.b32.xlu2 %v804_v58, %s1740_s23  ;;  %v430_v3 = vrot.slane %v2004_v63, 4  ;;  %856 = vst [vmem:[#allocation1 + $0x10] ss:$2 sm:$0xff] %v1873_v1 }
  0xe1   : > { %v435_v4 = vsel %vm239_vm1, %v430_v3, %v431_v62 }
  0xe2   : > { %v436_v5 = vsel %vm433_vm6, %v2004_v63, %v435_v4 }
  0xe3   : > { %v832_v6 = vld.sshfl [vmem:[#allocation1 + $0x8] sm:$0xff pattern:$0x75643120]  ;;  %v830_v7 = vld.sshfl [vmem:[#allocation1] sm:$0xff pattern:$0x75643120] }
  0xe4   : > { %781 = vrot.lane.b32.xlu0 %v775_v56, %s1739_s11  ;;  %854 = vst [vmem:[#allocation1] ss:$2 sm:$0xff] %v1871_v0  ;;  %s1745_s11 = smov 107  }
  0xe5   : > { %808 = vrot.lane.b32.xlu1 %v802_v59, %s1740_s23  ;;  %440 = vst [vmem:[#allocation2 + $0x48] sm:$0x33] %v436_v5 }
  0xe6   : > { %v534_v9 = vpop.permute.xlu2 %533  ;;  %v456_v11 = vpop.permute.xlu0 %455  ;;  %v861_v13 = vld.sshfl [vmem:[#allocation1 + $0x10] sm:$0xff pattern:$0x75643120] }
  0xe7   : > { %840 = vrot.lane.b32.xlu2 %v834_v2, %s1741_s27  ;;  %v459_v14 = vrot.slane %v456_v11, 4  ;;  %884 = vst [vmem:[#allocation1 + $0x11] ss:$2 sm:$0xff] %v1873_v1 }
  0xe9   : > { %v463_v16 = vsel %vm239_vm1, %v458_v8, %v459_v14 }
  0xea   : > { %v464_v19 = vsel %vm461_vm7, %v1995_v53, %v463_v16 }
  0xeb   : > { %v857_v20 = vld.sshfl [vmem:[#allocation1] sm:$0xff pattern:$0x75643120]  ;;  %v859_v25 = vld.sshfl [vmem:[#allocation1 + $0x8] sm:$0xff pattern:$0x75643120] }
  0xec   : > { %863 = vrot.lane.b32.xlu0 %v857_v20, %s1742_s26  ;;  %882 = vst [vmem:[#allocation1 + $0x1] ss:$2 sm:$0xff] %v1871_v0 }
  0xed   : > { %838 = vrot.lane.b32.xlu1 %v832_v6, %s1741_s27  ;;  %468 = vst [vmem:[#allocation2 + $0x48] sm:$0xcc] %v464_v19 }
  0xee   : > { %v2024_v28 = vpop.permute.xlu1 %480  ;;  %v2026_v34 = vpop.permute.xlu2 %563  ;;  %v889_v36 = vld.sshfl [vmem:[#allocation1 + $0x10] sm:$0xff pattern:$0x75643120] }
  0xef   : > { %867 = vrot.lane.b32.xlu2 %v861_v13, %s1742_s26  ;;  %v485_v37 = vrot.slane %v2024_v28, 4  ;;  %911 = vst [vmem:[#allocation1 + $0x10] ss:$2 sm:$0xff] %v1873_v1 }
  0xf1   : > { %v490_v38 = vsel %vm239_vm1, %v485_v37, %v486_v26 }
  0xf2   : > { %v491_v40 = vsel %vm488_vm8, %v2024_v28, %v490_v38 }
  0xf3   : > { %495 = vst [vmem:[#allocation2 + $0x58] sm:$0x33] %v491_v40  ;;  %v887_v41 = vld.sshfl [vmem:[#allocation1 + $0x8] sm:$0xff pattern:$0x75643120] }
  0xf4   : > { %893 = vrot.lane.b32.xlu0 %v887_v41, %s1743_s8  ;;  %v885_v42 = vld.sshfl [vmem:[#allocation1] sm:$0xff pattern:$0x75643120] }
  0xf5   : > { %865 = vrot.lane.b32.xlu1 %v859_v25, %s1742_s26  ;;  %909 = vst [vmem:[#allocation1] ss:$2 sm:$0xff] %v1871_v0  ;;  %v539_v0 = vrot.slane %v534_v9, 4 }
  0xf6   : > { %v511_v43 = vpop.permute.xlu1 %510  ;;  %v2037_v44 = vpop.permute.xlu0 %508  ;;  %v916_v48 = vld.sshfl [vmem:[#allocation1 + $0x10] sm:$0xff pattern:$0x75643120] }
  0xf7   : > { %836 = vrot.lane.b32.xlu2 %v830_v7, %s1741_s27  ;;  %v514_v1 = vrot.slane %v511_v43, 4  ;;  %v513_v45 = vrot.slane %v2037_v44, 4  ;;  %v593_v46 = vpop.permute.xlu2 %592 }
  0xf9   : > { %v518_v47 = vsel %vm239_vm1, %v513_v45, %v514_v1 }
  0xfa   : > { %v519_v49 = vsel %vm516_vm9, %v2037_v44, %v518_v47 }
  0xfb   : > { %523 = vst [vmem:[#allocation2 + $0x58] sm:$0xcc] %v519_v49 }
  0xfc   : > { %922 = vrot.lane.b32.xlu0 %v916_v48, %s1744_s10  ;;  %v914_v62 = vld.sshfl [vmem:[#allocation1 + $0x8] sm:$0xff pattern:$0x75643120] }
  0xfd   : > { %895 = vrot.lane.b32.xlu1 %v889_v36, %s1743_s8 }
  0xfe   : > { %v536_v52 = vpop.permute.xlu0 %535 }
  0xff   : > { %423 = vrot.lane.b32.xlu2 %v1917_v27, %s1726_s25  ;;  %v540_v54 = vrot.slane %v536_v52, 4  ;;  %v617_v55 = vpop.permute.xlu2 %616  ;;  %v538_v56 = vpop.permute.xlu1 %537  ;;  %v568_v27 = vrot.slane %v2026_v34, 4  ;;  %s1443_s25 = sshll.u32 %s1702_s15, 2 }
 0x100   : > { %v541_v57 = vrot.slane %v538_v56, 4  ;;  %v622_v26 = vrot.slane %v617_v55, 4 }
 0x101   : > { %v542_v58 = vsel %vm239_vm1, %v539_v0, %v540_v54 }
 0x102   : > { %v544_v59 = vsel %vm543_vm10, %v534_v9, %v542_v58  ;;  %v545_v60 = vsel %vm239_vm1, %v540_v54, %v541_v57  ;;  %v596_v9 = vrot.slane %v593_v46, 4 }
 0x103   : > { %549 = vst [vmem:[#allocation2 + $0x60] sm:$0x33] %v544_v59  ;;  %v546_v61 = vsel %vm543_vm10, %v536_v52, %v545_v60  ;;  %vm763_vm10 = vcmask 441344  }
 0x104   : > { %398 = vrot.lane.b32.xlu0 %v1912_v24, %s1745_s11  ;;  %550 = vst [vmem:[#allocation2 + $0x68] sm:$0x33] %v546_v61  ;;  %v912_v24 = vld.sshfl [vmem:[#allocation1] sm:$0xff pattern:$0x75643120] }
 0x105   : > { %400 = vrot.lane.b32.xlu1 %v1907_v22, %s1745_s11 }
 0x106   : > { %v566_v2 = vpop.permute.xlu0 %565 }
 0x107   : > { %920 = vrot.lane.b32.xlu2 %v914_v62, %s1744_s10  ;;  %v569_v4 = vrot.slane %v566_v2, 4  ;;  %v644_v5 = vpop.permute.xlu2 %643 }
 0x109   : > { %v573_v6 = vsel %vm239_vm1, %v568_v27, %v569_v4 }
 0x10a   : > { %v574_v7 = vsel %vm571_vm11, %v2026_v34, %v573_v6 }
 0x10b   : > { %578 = vst [vmem:[#allocation2 + $0x68] sm:$0xcc] %v574_v7 }
 0x10c   : > { %451 = vrot.lane.b32.xlu0 %v1922_v29, %s1727_s29  ;;  %s1444_s29 = sshll.u32 %s1706_s16, 3 }
 0x10d   : > { %891 = vrot.lane.b32.xlu1 %v885_v42, %s1743_s8 }
 0x10e   : > { %v562_v22 = vpop.permute.xlu0 %561 }
 0x10f   : > { %918 = vrot.lane.b32.xlu2 %v912_v24, %s1744_s10  ;;  %v567_v11 = vrot.slane %v562_v22, 4  ;;  %v591_v13 = vpop.permute.xlu1 %590  ;;  %v2065_v14 = vpop.permute.xlu2 %673 }
 0x110   : > { %v595_v16 = vrot.slane %v591_v13, 4 }
 0x111   : > { %v570_v19 = vsel %vm239_vm1, %v567_v11, %v568_v27 }
 0x112   : > { %v572_v20 = vsel %vm571_vm11, %v562_v22, %v570_v19  ;;  %v600_v25 = vsel %vm239_vm1, %v595_v16, %v596_v9  ;;  %vm818_vm11 = vcmask 367616  }
 0x113   : > { %577 = vst [vmem:[#allocation2 + $0x60] sm:$0xcc] %v572_v20  ;;  %v601_v29 = vsel %vm598_vm12, %v591_v13, %v600_v25 }
 0x114   : > { %605 = vst [vmem:[#allocation2 + $0x78] sm:$0x33] %v601_v29  ;;  %288 = vrot.lane.b32.xlu0 %v1885_v12, %s1722_s5  ;;  %v649_v12 = vrot.slane %v644_v5, 4 }
 0x115   : > { %478 = vrot.lane.b32.xlu1 %v1928_v32, %s1728_s30  ;;  %s1213_s30 = sadd.s32 %s1444_s29, %s1443_s25  ;;  %s1640_s25 = scalar_lea.hbm %s2235_s3, 128 }
 0x116   : > { %v619_v34 = vpop.permute.xlu0 %618  ;;  %s1445_s23 = sshll.u32 %s1213_s30, 3 }
 0x117   : > { %506 = vrot.lane.b32.xlu2 %v1934_v35, %s1729_s24  ;;  %v621_v36 = vpop.permute.xlu1 %620  ;;  %v623_v38 = vrot.slane %v619_v34, 4  ;;  %v703_v40 = vpop.permute.xlu2 %702  ;;  %s1313_s24 = sshll.u32 %s1863_s7, 5  ;;  %s1215_s8 = scalar_lea.hbm %s2235_s3, %s1445_s23 }
 0x118   : > { %v624_v41 = vrot.slane %v621_v36, 4  ;;  %s206_s10 = scalar_lea.vmem [#allocation6], %s1313_s24  ;;  %s1219_s16 = sshll.u32 %s1215_s8, 4  ;;  %s1220_s16 = int_to_ptr.hbm [resolvable:$true] %s1219_s16 }
 0x119   : > { %v625_v42 = vsel %vm239_vm1, %v622_v26, %v623_v38  ;;  %s1217_s15 = sshll.u32 %s206_s10, 4  ;;  %s1218_s15 = int_to_ptr.vmem [resolvable:$true] %s1217_s15 }
 0x11a   : > { %v627_v43 = vsel %vm626_vm13, %v617_v55, %v625_v42  ;;  %v628_v1 = vsel %vm239_vm1, %v623_v38, %v624_v41 }
 0x11b   : > { %v629_v46 = vsel %vm626_vm13, %v619_v34, %v628_v1  ;;  %632 = vst [vmem:[#allocation2 + $0x70] sm:$0xcc] %v627_v43  ;;  %vm846_vm13 = vcmask 359424  }
 0x11c   : > { %633 = vst [vmem:[#allocation2 + $0x78] sm:$0xcc] %v629_v46  ;;  %341 = vrot.lane.b32.xlu0 %v1896_v18, %s1724_s20 }
 0x11d   : > { %290 = vrot.lane.b32.xlu1 %v1882_v10, %s1722_s5  ;;  %v678_v10 = vrot.slane %v2065_v14, 4  ;;  %s1634_s5 = sshra.s32 %s1220_s16, 4  ;;  %s1635_s5 = int_to_ptr.hbm [resolvable:$true] %s1634_s5 }
 0x11e   : > { %v646_v32 = vpop.permute.xlu0 %645  ;;  %p1641_p7 = scmp.lt.s32.totalorder %s1635_s5, %s2235_s3 }
 0x11f   : > { %313 = vrot.lane.b32.xlu2 %v1891_v15, %s1723_s9  ;;  %v589_v35 = vpop.permute.xlu1 %588  ;;  %v650_v47 = vrot.slane %v646_v32, 4  ;;  %s1636_s9 = scalar_lea.hbm %s1635_s5, 32 }
 0x120   : > { %v594_v48 = vrot.slane %v589_v35, 4  ;;  %p1637_p3 = scmp.ne.s32.totalorder %s1635_s5, %s1636_s9  ;;  %p1642_p8 = scmp.lt.s32.totalorder %s1640_s25, %s1636_s9 }
 0x121   : > { %v652_v49 = vsel %vm239_vm1, %v649_v12, %v650_v47  ;;  %v2086_v0 = vpop.permute.xlu2 %757 }
 0x122   : > { %v597_v52 = vsel %vm239_vm1, %v594_v48, %v595_v16  ;;  %v654_v18 = vsel %vm653_vm14, %v644_v5, %v652_v49  ;;  %v761_v46 = vrot.slane %v2086_v0, 4  ;;  %p1638_p5 = pnand %p1637_p3, %p1832_p9  ;;  %p1643_p10 = por %p1642_p8, %p1641_p7 }
 0x123   : > { %v599_v54 = vsel %vm598_vm12, %v589_v35, %v597_v52  ;;  %659 = vst [vmem:[#allocation2 + $0x80] sm:$0x33] %v654_v18  ;;  %vm791_vm12 = vcmask 375808  }
 0x124   : > { %604 = vst [vmem:[#allocation2 + $0x70] sm:$0x33] %v599_v54  ;;  %p1639_p6 = pneg %p1638_p5 }
 0x125   : > { %368 = vrot.lane.b32.xlu1 %v1902_v21, %s1725_s21  ;;  %v706_v21 = vrot.slane %v703_v40, 4 }
 0x126   : > { %v676_v15 = vpop.permute.xlu0 %675  ;;  %p1644_p11 = pnand %p1643_p10, %p1639_p6 }
 0x127   : > { %396 = vrot.lane.b32.xlu2 %v1910_v23, %s1745_s11  ;;  %v648_v55 = vpop.permute.xlu1 %647  ;;  %v679_v56 = vrot.slane %v676_v15, 4  ;;  %s1202_s11 = scalar_lea.sflag [#allocation5], %s1863_s7 }
 0x128   : > { %v651_v57 = vrot.slane %v648_v55, 4 }
 0x129   : > { %v683_v58 = vsel %vm239_vm1, %v678_v10, %v679_v56  ;;  %v727_v59 = vpop.permute.xlu2 %726 }
 0x12a   : > { %v655_v60 = vsel %vm239_vm1, %v650_v47, %v651_v57  ;;  %v684_v61 = vsel %vm681_vm15, %v2065_v14, %v683_v58  ;;  %v732_v22 = vrot.slane %v727_v59, 4 }
 0x12b   : > { %v656_v62 = vsel %vm653_vm14, %v646_v32, %v655_v60  ;;  %688 = vst [vmem:[#allocation2 + $0x88] sm:$0xcc] %v684_v61  ;;  %v1746_v60 = vmov 0   ;;  %vm928_vm14 = vcmask 277504  }
 0x12c   : > { %660 = vst [vmem:[#allocation2 + $0x88] sm:$0x33] %v656_v62  ;;  %1589 = vset.pattern.permute.xlu0 %v1746_v60 }
 0x12d   : > { %939 = vst [vmem:[#allocation2 + $0xe8] sm:$0xff] %v1746_v60 }
 0x12e   : > { %v672_v27 = vpop.permute.xlu0 %671  ;;  %941 = vst [vmem:[#allocation2 + $0xf8] sm:$0xff] %v1746_v60 }
 0x12f   : > { %v677_v2 = vrot.slane %v672_v27, 4  ;;  %v701_v23 = vpop.permute.xlu1 %700  ;;  %936 = vst [vmem:[#allocation2 + $0xd0] sm:$0xcc] %v1746_v60 }
 0x130   : > { %v705_v4 = vrot.slane %v701_v23, 4  ;;  %937 = vst [vmem:[#allocation2 + $0xd8] sm:$0xcc] %v1746_v60 }
 0x131   : > { %v680_v5 = vsel %vm239_vm1, %v677_v2, %v678_v10  ;;  %v754_v6 = vpop.permute.xlu2 %753  ;;  %938 = vst [vmem:[#allocation2 + $0xe0] sm:$0xff] %v1746_v60 }
 0x132   : > { %v682_v7 = vsel %vm681_vm15, %v672_v27, %v680_v5  ;;  %v710_v24 = vsel %vm239_vm1, %v705_v4, %v706_v21  ;;  %v759_v42 = vrot.slane %v754_v6, 4  ;;  %940 = vst [vmem:[#allocation2 + $0xf0] sm:$0xff] %v1746_v60  ;;  %vm901_vm15 = vcmask 285696  }
 0x133   : > { %687 = vst [vmem:[#allocation2 + $0x80] sm:$0xcc] %v682_v7  ;;  %v711_v9 = vsel %vm708_vm0, %v710_v24, %v703_v40 }
 0x134   : > { %715 = vst [vmem:[#allocation2 + $0x98] sm:$0x33] %v711_v9  ;;  %v1436_v7 = vld [vmem:[#allocation2 + $0xe8] sm:$0xf]  ;;  %v1477_v24 = vld [vmem:[#allocation2 + $0xec] sm:$0xf] }
 0x136   : > { %v729_v11 = vpop.permute.xlu0 %728 }
 0x137   : > { %v731_v13 = vpop.permute.xlu1 %730  ;;  %v733_v14 = vrot.slane %v729_v11, 4 }
 0x138   : > { %v734_v16 = vrot.slane %v731_v13, 4 }
 0x139   : > { %v735_v19 = vsel %vm239_vm1, %v732_v22, %v733_v14  ;;  %v811_v20 = vpop.permute.xlu2 %810 }
 0x13a   : > { %v737_v25 = vsel %vm736_vm2, %v735_v19, %v729_v11  ;;  %v738_v29 = vsel %vm239_vm1, %v733_v14, %v734_v16  ;;  %v815_v52 = vrot.slane %v811_v20, 4  ;;  %v1479_v11 = vld [vmem:[#allocation2 + $0xf4] sm:$0xf0] }
 0x13b   : > { %v739_v26 = vsel %vm736_vm2, %v738_v29, %v731_v13  ;;  %742 = vst [vmem:[#allocation2 + $0x90] sm:$0xcc] %v737_v25  ;;  %v1438_v13 = vld [vmem:[#allocation2 + $0xf8] sm:$0xf0]  ;;  %v1437_v16 = vor.u32 %v1479_v11, %v1436_v7 }
 0x13c   : > { %743 = vst [vmem:[#allocation2 + $0x98] sm:$0xcc] %v739_v26  ;;  %v1441_v19 = vor.u32 %v1477_v24, %v1438_v13 }
 0x13d   : > { %1167 = vmatpush.bf16.msra.mxu2 %v1437_v16 }
 0x13e   : > { %1180 = vmatpush.bf16.msra.mxu3 %v1441_v19 }
 0x13f   : > { %v699_v34 = vpop.permute.xlu1 %698 }
 0x140   : > { %v704_v36 = vrot.slane %v699_v34, 4 }
 0x141   : > { %v2107_v38 = vpop.permute.xlu2 %840 }
 0x142   : > { %v707_v40 = vsel %vm239_vm1, %v704_v36, %v705_v4  ;;  %v844_v34 = vrot.slane %v2107_v38, 4 }
 0x143   : > { %v709_v41 = vsel %vm708_vm0, %v707_v40, %v701_v23  ;;  %vm406_vm0 = vcmask 875520  }
 0x144   : > { %714 = vst [vmem:[#allocation2 + $0x90] sm:$0x33] %v709_v41 }
 0x146   : > { %v784_v43 = vpop.permute.xlu0 %783 }
 0x147   : > { %v756_v1 = vpop.permute.xlu1 %755  ;;  %v788_v18 = vrot.slane %v784_v43, 4 }
 0x148   : > { %v760_v12 = vrot.slane %v756_v1, 4 }
 0x149   : > { %v2112_v32 = vpop.permute.xlu2 %867 }
 0x14a   : > { %v762_v35 = vsel %vm239_vm1, %v759_v42, %v760_v12  ;;  %v765_v47 = vsel %vm239_vm1, %v760_v12, %v761_v46  ;;  %v871_v46 = vrot.slane %v2112_v32, 4 }
 0x14b   : > { %v764_v48 = vsel %vm763_vm10, %v762_v35, %v756_v1  ;;  %v766_v49 = vsel %vm763_vm10, %v765_v47, %v2086_v0 }
 0x14c   : > { %769 = vst [vmem:[#allocation2 + $0xa0] sm:$0x33] %v764_v48  ;;  %v1428_v48 = vld [vmem:[#allocation2 + $0xe0] sm:$0xf] }
 0x14d   : > { %770 = vst [vmem:[#allocation2 + $0xa8] sm:$0x33] %v766_v49  ;;  %v1478_v49 = vld [vmem:[#allocation2 + $0xec] sm:$0xf0] }
 0x14e   : > { %v813_v54 = vpop.permute.xlu0 %812 }
 0x14f   : > { %v786_v10 = vpop.permute.xlu1 %785  ;;  %v816_v15 = vrot.slane %v813_v54, 4 }
 0x150   : > { %v789_v55 = vrot.slane %v786_v10, 4 }
 0x151   : > { %v820_v56 = vsel %vm239_vm1, %v815_v52, %v816_v15  ;;  %v837_v57 = vpop.permute.xlu2 %836  ;;  %v1430_v15 = vld [vmem:[#allocation2 + $0xf0] sm:$0xf0] }
 0x152   : > { %v793_v58 = vsel %vm239_vm1, %v788_v18, %v789_v55  ;;  %v821_v59 = vsel %vm818_vm11, %v820_v56, %v813_v54  ;;  %v842_v25 = vrot.slane %v837_v57, 4 }
 0x153   : > { %v794_v0 = vsel %vm791_vm12, %v793_v58, %v786_v10  ;;  %825 = vst [vmem:[#allocation2 + $0xb8] sm:$0x33] %v821_v59  ;;  %v1429_v10 = vor.u32 %v1478_v49, %v1428_v48  ;;  %v1467_v48 = vld [vmem:[#allocation2 + $0x94] sm:$0xf0]  ;;  %v1390_v49 = vld [vmem:[#allocation2 + $0x98] sm:$0xf0] }
 0x154   : > { %798 = vst [vmem:[#allocation2 + $0xa8] sm:$0xcc] %v794_v0 }
 0x155   : > { %1141 = vmatpush.bf16.msra.mxu0 %v1429_v10  ;;  %v1388_v10 = vld [vmem:[#allocation2 + $0x88] sm:$0xf] }
 0x156   : > { %v782_v61 = vpop.permute.xlu0 %781 }
 0x157   : > { %v787_v62 = vrot.slane %v782_v61, 4  ;;  %v809_v21 = vpop.permute.xlu1 %808 }
 0x158   : > { %v814_v27 = vrot.slane %v809_v21, 4 }
 0x159   : > { %v790_v2 = vsel %vm239_vm1, %v787_v62, %v788_v18  ;;  %v424_v23 = vpop.permute.xlu2 %423 }
 0x15a   : > { %v792_v4 = vsel %vm791_vm12, %v790_v2, %v784_v43  ;;  %v817_v5 = vsel %vm239_vm1, %v814_v27, %v815_v52  ;;  %v429_v6 = vrot.slane %v424_v23, 4  ;;  %v1476_v52 = vld [vmem:[#allocation2 + $0xe4] sm:$0xf] }
 0x15b   : > { %797 = vst [vmem:[#allocation2 + $0xa0] sm:$0xcc] %v792_v4  ;;  %v819_v9 = vsel %vm818_vm11, %v817_v5, %v811_v20  ;;  %v1433_v57 = vor.u32 %v1476_v52, %v1430_v15  ;;  %v1465_v15 = vld [vmem:[#allocation2 + $0x8c] sm:$0xf] }
 0x15c   : > { %824 = vst [vmem:[#allocation2 + $0xb0] sm:$0x33] %v819_v9  ;;  %v432_v22 = vsel %vm239_vm1, %v429_v6, %v430_v3 }
 0x15d   : > { %v434_v14 = vsel %vm433_vm6, %v424_v23, %v432_v22  ;;  %vm873_vm6 = vcmask 293888   ;;  %1154 = vmatpush.bf16.msra.mxu1 %v1433_v57  ;;  %v1463_v57 = vld [vmem:[#allocation2 + $0x74] sm:$0xf0] }
 0x15e   : > { %439 = vst [vmem:[#allocation2 + $0x40] sm:$0x33] %v434_v14  ;;  %v864_v29 = vpop.permute.xlu0 %863 }
 0x15f   : > { %v839_v26 = vpop.permute.xlu1 %838  ;;  %v869_v42 = vrot.slane %v864_v29, 4 }
 0x160   : > { %v843_v20 = vrot.slane %v839_v26, 4 }
 0x161   : > { %v921_v36 = vpop.permute.xlu2 %920 }
 0x162   : > { %v845_v63 = vsel %vm239_vm1, %v842_v25, %v843_v20  ;;  %v848_v3 = vsel %vm239_vm1, %v843_v20, %v844_v34  ;;  %v925_v12 = vrot.slane %v921_v36, 4 }
 0x163   : > { %v847_v40 = vsel %vm846_vm13, %v845_v63, %v839_v26  ;;  %v849_v41 = vsel %vm846_vm13, %v848_v3, %v2107_v38 }
 0x164   : > { %852 = vst [vmem:[#allocation2 + $0xb0] sm:$0xcc] %v847_v40 }
 0x165   : > { %853 = vst [vmem:[#allocation2 + $0xb8] sm:$0xcc] %v849_v41 }
 0x166   : > { %v2133_v43 = vpop.permute.xlu0 %893 }
 0x167   : > { %v866_v1 = vpop.permute.xlu1 %865  ;;  %v898_v60 = vrot.slane %v2133_v43, 4 }
 0x168   : > { %v870_v35 = vrot.slane %v866_v1, 4 }
 0x169   : > { %v919_v47 = vpop.permute.xlu2 %918 }
 0x16a   : > { %v872_v18 = vsel %vm239_vm1, %v869_v42, %v870_v35  ;;  %v875_v54 = vsel %vm239_vm1, %v870_v35, %v871_v46  ;;  %v924_v38 = vrot.slane %v919_v47, 4  ;;  %v1469_v46 = vld [vmem:[#allocation2 + $0xac] sm:$0xf] }
 0x16b   : > { %v874_v55 = vsel %vm873_vm6, %v872_v18, %v866_v1  ;;  %v876_v56 = vsel %vm873_vm6, %v875_v54, %v2112_v32  ;;  %v1404_v1 = vld [vmem:[#allocation2 + $0xa8] sm:$0xf]  ;;  %v1470_v28 = vld [vmem:[#allocation2 + $0xac] sm:$0xf0] }
 0x16c   : > { %879 = vst [vmem:[#allocation2 + $0xc0] sm:$0x33] %v874_v55  ;;  %v927_v58 = vsel %vm239_vm1, %v924_v38, %v925_v12  ;;  %v1471_v63 = vld [vmem:[#allocation2 + $0xb4] sm:$0xf0]  ;;  %v1406_v3 = vld [vmem:[#allocation2 + $0xb8] sm:$0xf0]  ;;  %v1393_v55 = vor.u32 %v1465_v15, %v1390_v49 }
 0x16d   : > { %880 = vst [vmem:[#allocation2 + $0xc8] sm:$0x33] %v876_v56  ;;  %v929_v59 = vsel %vm928_vm14, %v927_v58, %v921_v36  ;;  %v1405_v35 = vor.u32 %v1471_v63, %v1404_v1  ;;  %v1409_v47 = vor.u32 %v1469_v46, %v1406_v3  ;;  %v1374_v58 = vld [vmem:[#allocation2 + $0x78] sm:$0xf0]  ;;  %v1468_v63 = vld [vmem:[#allocation2 + $0xa4] sm:$0xf] }
 0x16e   : > { %v923_v0 = vpop.permute.xlu0 %922  ;;  %934 = vst [vmem:[#allocation2 + $0xd0] sm:$0x33] %v929_v59  ;;  %v292_v59 = vrot.slane %v1960_v17, 4  ;;  %v1453_v1 = vld [vmem:[#allocation2 + $0x2c] sm:$0xf] }
 0x16f   : > { %v896_v61 = vpop.permute.xlu1 %895  ;;  %v926_v62 = vrot.slane %v923_v0, 4  ;;  %v1364_v15 = vld [vmem:[#allocation2 + $0x60] sm:$0xf] }
 0x170   : > { %v899_v21 = vrot.slane %v896_v61, 4 }
 0x171   : > { %v930_v27 = vsel %vm239_vm1, %v925_v12, %v926_v62  ;;  %v507_v32 = vpop.permute.xlu2 %506  ;;  %v1461_v62 = vld [vmem:[#allocation2 + $0x6c] sm:$0xf] }
 0x172   : > { %v903_v2 = vsel %vm239_vm1, %v898_v60, %v899_v21  ;;  %v931_v23 = vsel %vm928_vm14, %v930_v27, %v923_v0  ;;  %v512_v4 = vrot.slane %v507_v32, 4 }
 0x173   : > { %v904_v5 = vsel %vm901_vm15, %v903_v2, %v896_v61  ;;  %935 = vst [vmem:[#allocation2 + $0xd8] sm:$0x33] %v931_v23  ;;  %v1372_v61 = vld [vmem:[#allocation2 + $0x68] sm:$0xf]  ;;  %v1459_v23 = vld [vmem:[#allocation2 + $0x54] sm:$0xf0] }
 0x174   : > { %908 = vst [vmem:[#allocation2 + $0xc8] sm:$0xcc] %v904_v5  ;;  %v515_v6 = vsel %vm239_vm1, %v512_v4, %v513_v45  ;;  %v1373_v27 = vor.u32 %v1463_v57, %v1372_v61 }
 0x175   : > { %v517_v7 = vsel %vm516_vm9, %v507_v32, %v515_v6  ;;  %v1377_v32 = vor.u32 %v1461_v62, %v1374_v58  ;;  %v1474_v6 = vld [vmem:[#allocation2 + $0xcc] sm:$0xf0] }
 0x176   : > { %522 = vst [vmem:[#allocation2 + $0x50] sm:$0xcc] %v517_v7  ;;  %v399_v24 = vpop.permute.xlu0 %398  ;;  %v1414_v7 = vld [vmem:[#allocation2 + $0xd0] sm:$0xf0] }
 0x177   : > { %v401_v9 = vpop.permute.xlu1 %400  ;;  %v403_v22 = vrot.slane %v399_v24, 4 }
 0x178   : > { %v404_v11 = vrot.slane %v401_v9, 4 }
 0x179   : > { %v314_v13 = vpop.permute.xlu2 %313 }
 0x17a   : > { %v408_v14 = vsel %vm239_vm1, %v403_v22, %v404_v11  ;;  %v319_v16 = vrot.slane %v314_v13, 4  ;;  %v1475_v19 = vld [vmem:[#allocation2 + $0xd4] sm:$0xf0]  ;;  %v1422_v25 = vld [vmem:[#allocation2 + $0xd8] sm:$0xf0] }
 0x17b   : > { %v409_v29 = vsel %vm406_vm0, %v399_v24, %v408_v14  ;;  %v1420_v26 = vld [vmem:[#allocation2 + $0xc8] sm:$0xf]  ;;  %v1473_v44 = vld [vmem:[#allocation2 + $0xcc] sm:$0xf]  ;;  %v1358_v24 = vld [vmem:[#allocation2 + $0x58] sm:$0xf0] }
 0x17c   : > { %413 = vst [vmem:[#allocation2 + $0x38] sm:$0xcc] %v409_v29  ;;  %v322_v45 = vsel %vm239_vm1, %v319_v16, %v320_v33  ;;  %v1421_v34 = vor.u32 %v1475_v19, %v1420_v26  ;;  %v1425_v20 = vor.u32 %v1473_v44, %v1422_v25  ;;  %v1356_v16 = vld [vmem:[#allocation2 + $0x48] sm:$0xf]  ;;  %v1457_v19 = vld [vmem:[#allocation2 + $0x4c] sm:$0xf] }
 0x17d   : > { %v324_v36 = vsel %vm323_vm3, %v314_v13, %v322_v45  ;;  %vm296_vm3 = vcmask 965632   ;;  %v1361_v25 = vor.u32 %v1457_v19, %v1358_v24  ;;  %v1398_v29 = vld [vmem:[#allocation2 + $0xb0] sm:$0xf0] }
 0x17e   : > { %329 = vst [vmem:[#allocation2 + $0x20] sm:$0x33] %v324_v36  ;;  %1168 = vmatpush.bf16.msra.mxu2 %v1421_v34  ;;  %1181 = vmatpush.bf16.msra.mxu3 %v1425_v20  ;;  %v452_v40 = vpop.permute.xlu0 %451  ;;  %v1396_v36 = vld [vmem:[#allocation2 + $0xa0] sm:$0xf] }
 0x17f   : > { %v457_v41 = vrot.slane %v452_v40, 4  ;;  %v892_v42 = vpop.permute.xlu1 %891 }
 0x180   : > { %v897_v12 = vrot.slane %v892_v42, 4  ;;  %v1340_v42 = vld [vmem:[#allocation2 + $0x28] sm:$0xf] }
 0x181   : > { %v460_v31 = vsel %vm239_vm1, %v457_v41, %v458_v8  ;;  %v397_v33 = vpop.permute.xlu2 %396  ;;  %v1389_v8 = vor.u32 %v1467_v48, %v1388_v10  ;;  %v1401_v41 = vor.u32 %v1468_v63, %v1398_v29 }
 0x182   : > { %v462_v52 = vsel %vm461_vm7, %v452_v40, %v460_v31  ;;  %v900_v18 = vsel %vm239_vm1, %v897_v12, %v898_v60  ;;  %v402_v54 = vrot.slane %v397_v33, 4  ;;  %1169 = vmatpush.bf16.msra.mxu2 %v1405_v35  ;;  %1182 = vmatpush.bf16.msra.mxu3 %v1409_v47  ;;  %v1397_v40 = vor.u32 %v1470_v28, %v1396_v36  ;;  %v1466_v47 = vld [vmem:[#allocation2 + $0x8c] sm:$0xf0]  ;;  %v1382_v31 = vld [vmem:[#allocation2 + $0x90] sm:$0xf0] }
 0x183   : > { %467 = vst [vmem:[#allocation2 + $0x40] sm:$0xcc] %v462_v52  ;;  %v902_v38 = vsel %vm901_vm15, %v900_v18, %v2133_v43  ;;  %v1455_v44 = vld [vmem:[#allocation2 + $0x34] sm:$0xf0]  ;;  %v1342_v45 = vld [vmem:[#allocation2 + $0x38] sm:$0xf0] }
 0x184   : > { %907 = vst [vmem:[#allocation2 + $0xc0] sm:$0xcc] %v902_v38  ;;  %v405_v53 = vsel %vm239_vm1, %v402_v54, %v403_v22  ;;  %v1341_v12 = vor.u32 %v1455_v44, %v1340_v42  ;;  %v1345_v35 = vor.u32 %v1453_v1, %v1342_v45  ;;  %v1380_v52 = vld [vmem:[#allocation2 + $0x80] sm:$0xf]  ;;  %v1464_v18 = vld [vmem:[#allocation2 + $0x84] sm:$0xf] }
 0x185   : > { %v407_v56 = vsel %vm406_vm0, %v397_v33, %v405_v53  ;;  %v1381_v30 = vor.u32 %v1466_v47, %v1380_v52  ;;  %v1462_v54 = vld [vmem:[#allocation2 + $0x6c] sm:$0xf0]  ;;  %v1366_v38 = vld [vmem:[#allocation2 + $0x70] sm:$0xf0]  ;;  %v1460_v53 = vld [vmem:[#allocation2 + $0x64] sm:$0xf] }
 0x186   : > { %412 = vst [vmem:[#allocation2 + $0x30] sm:$0xcc] %v407_v56  ;;  %1170 = vmatpush.bf16.msra.mxu2 %v1389_v8  ;;  %1183 = vmatpush.bf16.msra.mxu3 %v1393_v55  ;;  %v289_v60 = vpop.permute.xlu0 %288  ;;  %v1365_v55 = vor.u32 %v1462_v54, %v1364_v15  ;;  %v1369_v56 = vor.u32 %v1460_v53, %v1366_v38 }
 0x187   : > { %v293_v0 = vrot.slane %v289_v60, 4  ;;  %v479_v43 = vpop.permute.xlu1 %478 }
 0x188   : > { %v484_v21 = vrot.slane %v479_v43, 4 }
 0x189   : > { %v295_v2 = vsel %vm239_vm1, %v292_v59, %v293_v0 }
 0x18a   : > { %v297_v4 = vsel %vm296_vm3, %v1960_v17, %v295_v2  ;;  %v487_v5 = vsel %vm239_vm1, %v484_v21, %v485_v37  ;;  %1171 = vmatpush.bf16.msra.mxu2 %v1373_v27  ;;  %1184 = vmatpush.bf16.msra.mxu3 %v1377_v32  ;;  %v1357_v17 = vor.u32 %v1459_v23, %v1356_v16  ;;  %v975_v37 = vld [vmem:[%s2234_s2] sm:$0xff]  ;;  %v1456_v62 = vld [vmem:[#allocation2 + $0x44] sm:$0xf] }
 0x18b   : > { %302 = vst [vmem:[#allocation2 + $0x10] sm:$0xcc] %v297_v4  ;;  %v489_v9 = vsel %vm488_vm8, %v479_v43, %v487_v5  ;;  %v1412_v22 = vld [vmem:[#allocation2 + $0xc0] sm:$0xf]  ;;  %v1472_v11 = vld [vmem:[#allocation2 + $0xc4] sm:$0xf]  ;;  %978 = vperm.xlu0 %1589, %v975_v37  }
 0x18c   : > { %494 = vst [vmem:[#allocation2 + $0x50] sm:$0x33] %v489_v9  ;;  %v1413_v13 = vor.u32 %v1474_v6, %v1412_v22  ;;  %v1417_v14 = vor.u32 %v1472_v11, %v1414_v7  ;;  %v1449_v43 = vld [vmem:[#allocation2 + $0xc] sm:$0xf] }
 0x18e   : > { %1142 = vmatpush.bf16.msra.mxu0 %v1413_v13  ;;  %1155 = vmatpush.bf16.msra.mxu1 %v1417_v14  ;;  %v342_v26 = vpop.permute.xlu0 %341  ;;  %v1316_v13 = vld [vmem:[#allocation2] sm:$0xf]  ;;  %v1448_v14 = vld [vmem:[#allocation2 + $0x4] sm:$0xf] }
 0x18f   : > { %1172 = vmatpush.bf16.msra.mxu2 %v1357_v17  ;;  %1185 = vmatpush.bf16.msra.mxu3 %v1361_v25  ;;  %v347_v34 = vrot.slane %v342_v26, 4  ;;  %v291_v20 = vpop.permute.xlu1 %290 }
 0x190   : > { %v294_v3 = vrot.slane %v291_v20, 4 }
 0x191   : > { %v350_v46 = vsel %vm239_vm1, %v347_v34, %v348_v39  ;;  %v1385_v39 = vor.u32 %v1464_v18, %v1382_v31 }
 0x192   : > { %v352_v33 = vsel %vm351_vm4, %v342_v26, %v350_v46  ;;  %v298_v48 = vsel %vm239_vm1, %v293_v0, %v294_v3  ;;  %1143 = vmatpush.bf16.msra.mxu0 %v1397_v40  ;;  %1156 = vmatpush.bf16.msra.mxu1 %v1401_v41  ;;  %v1324_v0 = vld [vmem:[#allocation2 + $0x8] sm:$0xf]  ;;  %v1450_v22 = vld [vmem:[#allocation2 + $0xc] sm:$0xf0]  ;;  %v1318_v11 = vld [vmem:[#allocation2 + $0x10] sm:$0xf0] }
 0x193   : > { %357 = vst [vmem:[#allocation2 + $0x20] sm:$0xcc] %v352_v33  ;;  %v299_v49 = vsel %vm296_vm3, %v289_v60, %v298_v48  ;;  %1173 = vmatpush.bf16.msra.mxu2 %v1341_v12  ;;  %1186 = vmatpush.bf16.msra.mxu3 %v1345_v35  ;;  %v1458_v57 = vld [vmem:[#allocation2 + $0x4c] sm:$0xf0]  ;;  %v1350_v58 = vld [vmem:[#allocation2 + $0x50] sm:$0xf0]  ;;  %v1317_v16 = vor.u32 %v1450_v22, %v1316_v13 }
 0x194   : > { %303 = vst [vmem:[#allocation2 + $0x18] sm:$0xcc] %v299_v49  ;;  %v1348_v60 = vld [vmem:[#allocation2 + $0x40] sm:$0xf]  ;;  %v1353_v2 = vor.u32 %v1456_v62, %v1350_v58  ;;  %v1321_v19 = vor.u32 %v1448_v14, %v1318_v11 }
 0x195   : > { %v1349_v32 = vor.u32 %v1458_v57, %v1348_v60 }
 0x196   : > { %1144 = vmatpush.bf16.msra.mxu0 %v1381_v30  ;;  %1157 = vmatpush.bf16.msra.mxu1 %v1385_v39 }
 0x197   : > { %v369_v10 = vpop.permute.xlu1 %368 }
 0x198   : > { %v374_v8 = vrot.slane %v369_v10, 4 }
 0x19a   : > { %v377_v59 = vsel %vm239_vm1, %v374_v8, %v375_v51  ;;  %1145 = vmatpush.bf16.msra.mxu0 %v1365_v55  ;;  %1158 = vmatpush.bf16.msra.mxu1 %v1369_v56  ;;  %v1332_v51 = vld [vmem:[#allocation2 + $0x20] sm:$0xf]  ;;  %v1452_v6 = vld [vmem:[#allocation2 + $0x24] sm:$0xf] }
 0x19b   : > { %v379_v61 = vsel %vm378_vm5, %v369_v10, %v377_v59  ;;  %v1451_v21 = vld [vmem:[#allocation2 + $0x14] sm:$0xf0]  ;;  %v1326_v27 = vld [vmem:[#allocation2 + $0x18] sm:$0xf0] }
 0x19c   : > { %384 = vst [vmem:[#allocation2 + $0x30] sm:$0x33] %v379_v61  ;;  %v1325_v23 = vor.u32 %v1451_v21, %v1324_v0  ;;  %v1329_v4 = vor.u32 %v1449_v43, %v1326_v27 }
 0x19e   : > { %1146 = vmatpush.bf16.msra.mxu0 %v1349_v32  ;;  %1159 = vmatpush.bf16.msra.mxu1 %v1353_v2 }
 0x19f   : > { %1174 = vmatpush.bf16.msra.mxu2 %v1325_v23  ;;  %1187 = vmatpush.bf16.msra.mxu3 %v1329_v4 }
 0x1a2   : > { %1175 = vmatmul.bf16.vlgmr.msra.gmra.mxu2 %v942_v50  ;;  %1188 = vmatmul.bf16.vlgmr.msra.gmra.mxu3 %v942_v50 }
 0x1a3   : > { %v1454_v5 = vld [vmem:[#allocation2 + $0x2c] sm:$0xf0]  ;;  %v1334_v7 = vld [vmem:[#allocation2 + $0x30] sm:$0xf0] }
 0x1a4   : > { %v1333_v24 = vor.u32 %v1454_v5, %v1332_v51  ;;  %v1337_v9 = vor.u32 %v1452_v6, %v1334_v7 }
 0x1a6   : > { %1147 = vmatpush.bf16.msra.mxu0 %v1333_v24  ;;  %1160 = vmatpush.bf16.msra.mxu1 %v1337_v9 }
 0x1aa   : > { %1148 = vmatpush.bf16.msra.mxu0 %v1317_v16  ;;  %1161 = vmatpush.bf16.msra.mxu1 %v1321_v19 }
 0x1ad   : > { %1149 = vmatmul.bf16.vlgmr.msra.gmra.mxu0 %v942_v50  ;;  %1162 = vmatmul.bf16.vlgmr.msra.gmra.mxu1 %v942_v50 }
 0x1fd   : > { %v979_v17 = vpop.permute.xlu0 %978 }
 0x225   : > { %v1176_v25 = vpop.f32.mrf.mxu2  ;;  %v1189_v28 = vpop.f32.mrf.mxu3 }
 0x226   : > { %v1177_v29 = vadd.f32 %v1176_v25, %v979_v17  ;;  %v1190_v37 = vadd.f32 %v1189_v28, %v979_v17 }
 0x228   : > { %v1195_v26 = vmax.f32 %v1177_v29, 0.0  ;;  %v1196_v44 = vmax.f32 %v1190_v37, 0.0 }
 0x22a   : > { %1199 = vst [vmem:[%s206_s10 + $0x10] sm:$0xff] %v1195_v26  ;;  %v1150_v45 = vpop.f32.mrf.mxu0  ;;  %v1163_v34 = vpop.f32.mrf.mxu1 }
 0x22b   : > { %1200 = vst [vmem:[%s206_s10 + $0x18] sm:$0xff] %v1196_v44  ;;  %v1151_v20 = vadd.f32 %v1150_v45, %v979_v17  ;;  %v1164_v36 = vadd.f32 %v1163_v34, %v979_v17 }
 0x22d   : > { %v1193_v63 = vmax.f32 %v1151_v20, 0.0  ;;  %v1194_v3 = vmax.f32 %v1164_v36, 0.0  ;;  %v1178_v40 = vpop.f32.mrf.mxu2  ;;  %v1191_v41 = vpop.f32.mrf.mxu3 }
 0x22f   : > { %1197 = vst [vmem:[%s206_s10] sm:$0xff] %v1193_v63 }
 0x230   : > { %1198 = vst [vmem:[%s206_s10 + $0x8] sm:$0xff] %v1194_v3 }
 0x231   : > { %1647 = shalt.err (!%p1644_p11)
}
 0x232   : > { %1486 = dma.vmem_to_hbm [thread:$0]  (%p1832_p9), %s1218_s15, 512, %s1220_s16, %s1202_s11   ;;  %v1152_v42 = vpop.f32.mrf.mxu0  ;;  %v1165_v1 = vpop.f32.mrf.mxu1 }
 0x233 PF: > { %p1497_p13 = scmp.ge.s32.totalorder %s1718_s19, 2  ;;  %s1231_s7 = sand.u32 1, %s1690_s12  }
 0x234   : > { %s1232_s24 = scalar_lea.sflag [#allocation5], %s1231_s7 }
 0x235   : > { %p1493_p0 = pnand %p1497_p13, %p1838_p12 }
 0x237   : > { %p1494_p1 = pneg %p1493_p0 }
 0x239   : > { %1685 = dma.done.wait (%p1494_p1), %s1232_s24, 512  }
 0x23a   : > { %1687 = vsyncadd (%p1494_p1), %s1232_s24, 4294966784  ;;  %s19_s19 = sadd.s32 1, %s1718_s19   ;;  %s2243_s28 = sld [smem:[#allocation9_spill]] }
 0x23b   : > { %p16_p2 = scmp.ge.s32.totalorder %s19_s19, 6   ;;  %s2244_s12 = smov %s1694_s13 }
 0x23c   : > { %s2245_s13 = smov %s1698_s14  ;;  %s2246_s14 = smov %s1845_s6 }
 0x23d   : > { %s2247_s15 = smov %s1710_s17  ;;  %s2248_s16 = smov %s1714_s18 }
 0x23e   : > { %s2249_s17 = smov %s2252_s22  ;;  %18 = sbr.rel (!%p16_p2) target bundleno = 7 (0x7), region = 116 }
 0x240   : > { %s2250_s18 = smov %s2243_s28 }
 0x243   :  { %1238 = vsyncpa [#allocation4], 1 }
 0x244   :  { %1240 = vsyncpa [#allocation4 + $0x1], 1 }
 0x245   :  { %1241 = vsyncpa [#allocation5], 1 }
 0x246   :  { %1243 = vsyncpa [#allocation5 + $0x1], 1 }

</bundles_post_ra>
